<compile_context>
chip_gen: v5e
topology: v5e:2x2
jax: 0.10.0
libtpu: 0.0.40
codegen_flags: <defaults>
</compile_context>

<pallas_src>
import jax
import jax.numpy as jnp
from jax.experimental import pallas as pl
from jax.experimental.pallas import tpu as pltpu

STATE_DIM = 3
ACTION_DIM = 2
SA_DIM = STATE_DIM + ACTION_DIM
H1 = 800
H2 = 600


def _critic_head_kernel(sa_ref, wA_ref, bA_ref, wB_ref, bB_ref, wC_ref, bC_ref,
                        q_ref):
    """One Q head per grid step (grid axis 0 == head index)."""
    sa = sa_ref[...]                                              # [B, 5] f32

    # Layer 1/4: [B,5] @ [5,800]  -- bf16 operands, f32 accumulation (MXU)
    h = jnp.dot(sa.astype(jnp.bfloat16), wA_ref[...],
                preferred_element_type=jnp.float32) + bA_ref[...]
    h = jnp.maximum(h, 0.0)

    # Layer 2/5: [B,800] @ [800,600]
    h = jnp.dot(h.astype(jnp.bfloat16), wB_ref[...],
                preferred_element_type=jnp.float32) + bB_ref[...]
    h = jnp.maximum(h, 0.0)

    # Layer 3/6 (out_features == 1): keep it off the MXU.  VPU broadcast
    # multiply + XLU lane reduction; weights kept in f32 (only 600 floats).
    q = jnp.sum(h * wC_ref[...], axis=-1, keepdims=True) + bC_ref[...]
    q_ref[...] = jnp.maximum(q, 0.0)


def critic_forward(s, a, params):
    """s: [B, STATE_DIM], a: [B, ACTION_DIM]. Returns (q1, q2), each [B, 1]."""
    sa = jnp.concatenate([s, a], axis=1).astype(jnp.float32)      # [B, 5]
    B = sa.shape[0]

    # Stack the two heads along a leading axis -> size-2 "parallel" grid axis.
    wA = jnp.stack([params["w1"], params["w4"]]).astype(jnp.bfloat16)  # [2,5,800]
    bA = jnp.stack([params["b1"], params["b4"]])                       # [2,1,800]
    wB = jnp.stack([params["w2"], params["w5"]]).astype(jnp.bfloat16)  # [2,800,600]
    bB = jnp.stack([params["b2"], params["b5"]])                       # [2,1,600]
    wC = jnp.stack([params["w3"].T, params["w6"].T])                   # [2,1,600] f32
    bC = jnp.stack([params["b3"], params["b6"]])                       # [2,1,1]   f32

    flops = 2 * 2 * B * (SA_DIM * H1 + H1 * H2 + H2)
    bytes_accessed = (wA.size * 2 + wB.size * 2                        # bf16 weights
                      + (bA.size + bB.size + wC.size + bC.size) * 4    # f32 small
                      + sa.size * 4 + 2 * B * 1 * 4)                   # io

    q = pl.pallas_call(
        _critic_head_kernel,
        out_shape=jax.ShapeDtypeStruct((2, B, 1), jnp.float32),
        grid=(2,),
        in_specs=[
            pl.BlockSpec((B, SA_DIM), lambda h: (0, 0)),          # sa (shared)
            pl.BlockSpec((None, SA_DIM, H1), lambda h: (h, 0, 0)),  # wA
            pl.BlockSpec((None, 1, H1), lambda h: (h, 0, 0)),       # bA
            pl.BlockSpec((None, H1, H2), lambda h: (h, 0, 0)),      # wB
            pl.BlockSpec((None, 1, H2), lambda h: (h, 0, 0)),       # bB
            pl.BlockSpec((None, 1, H2), lambda h: (h, 0, 0)),       # wC (row)
            pl.BlockSpec((None, 1, 1), lambda h: (h, 0, 0)),        # bC
        ],
        out_specs=pl.BlockSpec((None, B, 1), lambda h: (h, 0, 0)),
        compiler_params=pltpu.CompilerParams(
            dimension_semantics=("parallel",),
            vmem_limit_bytes=16 << 20),
        cost_estimate=pl.CostEstimate(flops=flops, transcendentals=0,
                                      bytes_accessed=bytes_accessed),
    )(sa, wA, bA, wB, bB, wC, bC)

    return q[0], q[1]


def init_params(key):
    """Deterministic init matching PyTorch nn.Linear default:
    U(-1/sqrt(fan_in), 1/sqrt(fan_in)). Weights stored [in, out], f32 master."""
    dims = [
        ("w1", "b1", SA_DIM, H1),
        ("w2", "b2", H1, H2),
        ("w3", "b3", H2, 1),
        ("w4", "b4", SA_DIM, H1),
        ("w5", "b5", H1, H2),
        ("w6", "b6", H2, 1),
    ]
    params = {}
    keys = jax.random.split(key, 2 * len(dims))
    for i, (wn, bn, fan_in, fan_out) in enumerate(dims):
        bound = 1.0 / (fan_in ** 0.5)
        params[wn] = jax.random.uniform(
            keys[2 * i], (fan_in, fan_out), jnp.float32, -bound, bound)
        params[bn] = jax.random.uniform(
            keys[2 * i + 1], (1, fan_out), jnp.float32, -bound, bound)
    return params


def reference_forward(s, a, params):
    """Pure-JAX f32 reference matching the PyTorch module semantics."""
    sa = jnp.concatenate([s, a], axis=1)

    def head(wa, ba, wb, bb, wc, bc):
        h = jax.nn.relu(sa @ wa + ba)
        h = jax.nn.relu(h @ wb + bb)
        return jax.nn.relu(h @ wc + bc)

    q1 = head(params["w1"], params["b1"], params["w2"], params["b2"],
              params["w3"], params["b3"])
    q2 = head(params["w4"], params["b4"], params["w5"], params["b5"],
              params["w6"], params["b6"])
    return q1, q2


if __name__ == "__main__":
    key = jax.random.PRNGKey(0)
    k_s, k_a, k_p = jax.random.split(key, 3)

    B = 8  # multiple of 8 (f32 sublane); larger batches amortize weight DMA
    s = jax.random.normal(k_s, (B, STATE_DIM), jnp.float32)
    a = jax.random.normal(k_a, (B, ACTION_DIM), jnp.float32)
    params = init_params(k_p)

    q1, q2 = critic_forward(s, a, params)
    jax.block_until_ready((q1, q2))

    # Correctness check against the f32 reference (loose tolerance because the
    # kernel uses bf16 weights with f32 accumulation).
    q1_ref, q2_ref = reference_forward(s, a, params)
    assert q1.shape == (B, 1) and q2.shape == (B, 1)
    assert jnp.allclose(q1, q1_ref, atol=3e-2, rtol=3e-2)
    assert jnp.allclose(q2, q2_ref, atol=3e-2, rtol=3e-2)

    print("KERNEL_OK")
</pallas_src>

<mosaic_0001>
module attributes {stable_mosaic.version = 11 : i64} {
  func.func @_critic_head_kernel(%arg0: i32, %arg1: memref<8x5xf32, #tpu.memory_space<vmem>>, %arg2: memref<1x5x800xbf16, #tpu.memory_space<vmem>>, %arg3: memref<1x1x800xf32, #tpu.memory_space<vmem>>, %arg4: memref<1x800x600xbf16, #tpu.memory_space<vmem>>, %arg5: memref<1x1x600xf32, #tpu.memory_space<vmem>>, %arg6: memref<1x1x600xf32, #tpu.memory_space<vmem>>, %arg7: memref<1x1x1xf32, #tpu.memory_space<vmem>>, %arg8: memref<1x8x1xf32, #tpu.memory_space<vmem>>) attributes {dimension_semantics = [#tpu.dimension_semantics<parallel>], iteration_bounds = array<i64: 2>, scalar_prefetch = 0 : i64, scratch_operands = 0 : i64, tpu.core_type = #tpu.core_type<tc>, window_params = [{pipeline_mode = #tpu.pipeline_mode<synchronous>, transform_indices = @transform_0, window_bounds = array<i64: 8, 5>}, {transform_indices = @transform_1, window_bounds = array<i64: 1, 5, 800>}, {transform_indices = @transform_2, window_bounds = array<i64: 1, 1, 800>}, {transform_indices = @transform_3, window_bounds = array<i64: 1, 800, 600>}, {transform_indices = @transform_4, window_bounds = array<i64: 1, 1, 600>}, {transform_indices = @transform_5, window_bounds = array<i64: 1, 1, 600>}, {transform_indices = @transform_6, window_bounds = array<i64: 1, 1, 1>}, {transform_indices = @transform_7, window_bounds = array<i64: 1, 8, 1>}]} {
    %c0 = arith.constant 0 : index
    %c0_0 = arith.constant 0 : index
    %0 = vector.load %arg1[%c0, %c0_0] : memref<8x5xf32, #tpu.memory_space<vmem>>, vector<8x5xf32>
    %1 = arith.truncf %0 : vector<8x5xf32> to vector<8x5xbf16>
    %c0_1 = arith.constant 0 : index
    %c0_2 = arith.constant 0 : index
    %c0_3 = arith.constant 0 : index
    %2 = vector.load %arg2[%c0_1, %c0_2, %c0_3] : memref<1x5x800xbf16, #tpu.memory_space<vmem>>, vector<1x5x800xbf16>
    %3 = vector.shape_cast %2 : vector<1x5x800xbf16> to vector<5x800xbf16>
    %cst = arith.constant dense<0.000000e+00> : vector<8x800xf32>
    %4 = tpu.matmul %1, %3, %cst {dimension_numbers = #tpu.dot_dimension_numbers<[1], [0], [0], [1], [0, 0, 1, 1], [], []>} : vector<8x5xbf16>, vector<5x800xbf16>, vector<8x800xf32> -> vector<8x800xf32>
    %c0_4 = arith.constant 0 : index
    %c0_5 = arith.constant 0 : index
    %c0_6 = arith.constant 0 : index
    %5 = vector.load %arg3[%c0_4, %c0_5, %c0_6] : memref<1x1x800xf32, #tpu.memory_space<vmem>>, vector<1x1x800xf32>
    %6 = vector.shape_cast %5 : vector<1x1x800xf32> to vector<1x800xf32>
    %7 = vector.broadcast %6 : vector<1x800xf32> to vector<8x800xf32>
    %8 = arith.addf %4, %7 : vector<8x800xf32>
    %cst_7 = arith.constant 0.000000e+00 : f32
    %9 = vector.broadcast %cst_7 : f32 to vector<8x800xf32>
    %10 = arith.maximumf %8, %9 : vector<8x800xf32>
    %11 = arith.truncf %10 : vector<8x800xf32> to vector<8x800xbf16>
    %c0_8 = arith.constant 0 : index
    %c0_9 = arith.constant 0 : index
    %c0_10 = arith.constant 0 : index
    %12 = vector.load %arg4[%c0_8, %c0_9, %c0_10] : memref<1x800x600xbf16, #tpu.memory_space<vmem>>, vector<1x800x600xbf16>
    %13 = vector.shape_cast %12 : vector<1x800x600xbf16> to vector<800x600xbf16>
    %cst_11 = arith.constant dense<0.000000e+00> : vector<8x600xf32>
    %14 = tpu.matmul %11, %13, %cst_11 {dimension_numbers = #tpu.dot_dimension_numbers<[1], [0], [0], [1], [0, 0, 1, 1], [], []>} : vector<8x800xbf16>, vector<800x600xbf16>, vector<8x600xf32> -> vector<8x600xf32>
    %c0_12 = arith.constant 0 : index
    %c0_13 = arith.constant 0 : index
    %c0_14 = arith.constant 0 : index
    %15 = vector.load %arg5[%c0_12, %c0_13, %c0_14] : memref<1x1x600xf32, #tpu.memory_space<vmem>>, vector<1x1x600xf32>
    %16 = vector.shape_cast %15 : vector<1x1x600xf32> to vector<1x600xf32>
    %17 = vector.broadcast %16 : vector<1x600xf32> to vector<8x600xf32>
    %18 = arith.addf %14, %17 : vector<8x600xf32>
    %cst_15 = arith.constant 0.000000e+00 : f32
    %19 = vector.broadcast %cst_15 : f32 to vector<8x600xf32>
    %20 = arith.maximumf %18, %19 : vector<8x600xf32>
    %c0_16 = arith.constant 0 : index
    %c0_17 = arith.constant 0 : index
    %c0_18 = arith.constant 0 : index
    %21 = vector.load %arg6[%c0_16, %c0_17, %c0_18] : memref<1x1x600xf32, #tpu.memory_space<vmem>>, vector<1x1x600xf32>
    %22 = vector.shape_cast %21 : vector<1x1x600xf32> to vector<1x600xf32>
    %23 = vector.broadcast %22 : vector<1x600xf32> to vector<8x600xf32>
    %24 = arith.mulf %20, %23 : vector<8x600xf32>
    %cst_19 = arith.constant dense<0.000000e+00> : vector<8xf32>
    %25 = vector.multi_reduction <add>, %24, %cst_19 [1] : vector<8x600xf32> to vector<8xf32>
    %26 = vector.shape_cast %25 : vector<8xf32> to vector<8x1xf32>
    %c0_20 = arith.constant 0 : index
    %c0_21 = arith.constant 0 : index
    %c0_22 = arith.constant 0 : index
    %27 = vector.load %arg7[%c0_20, %c0_21, %c0_22] : memref<1x1x1xf32, #tpu.memory_space<vmem>>, vector<1x1x1xf32>
    %28 = vector.shape_cast %27 : vector<1x1x1xf32> to vector<1x1xf32>
    %29 = vector.broadcast %28 : vector<1x1xf32> to vector<8x1xf32>
    %30 = arith.addf %26, %29 : vector<8x1xf32>
    %cst_23 = arith.constant 0.000000e+00 : f32
    %31 = vector.broadcast %cst_23 : f32 to vector<8x1xf32>
    %32 = arith.maximumf %30, %31 : vector<8x1xf32>
    %c0_24 = arith.constant 0 : index
    %c0_25 = arith.constant 0 : index
    %c0_26 = arith.constant 0 : index
    %33 = vector.load %arg8[%c0_24, %c0_25, %c0_26] : memref<1x8x1xf32, #tpu.memory_space<vmem>>, vector<1x8x1xf32>
    %34 = vector.shape_cast %33 : vector<1x8x1xf32> to vector<8x1xf32>
    %35 = vector.shape_cast %32 : vector<8x1xf32> to vector<1x8x1xf32>
    tpu.vector_store %arg8[%c0_24, %c0_25, %c0_26], %35 {strides = array<i32>} : memref<1x8x1xf32, #tpu.memory_space<vmem>>, vector<1x8x1xf32>,
    return
  }
  func.func @transform_0(%arg0: i32) -> (i32, i32) {
    %c0_i32 = arith.constant 0 : i32
    %c0_i32_0 = arith.constant 0 : i32
    %c0_i32_1 = arith.constant 0 : i32
    return %c0_i32, %c0_i32_0 : i32, i32
  }
  func.func @transform_1(%arg0: i32) -> (i32, i32, i32) {
    %c0_i32 = arith.constant 0 : i32
    %c0_i32_0 = arith.constant 0 : i32
    %c0_i32_1 = arith.constant 0 : i32
    return %arg0, %c0_i32, %c0_i32_0 : i32, i32, i32
  }
  func.func @transform_2(%arg0: i32) -> (i32, i32, i32) {
    %c0_i32 = arith.constant 0 : i32
    %c0_i32_0 = arith.constant 0 : i32
    %c0_i32_1 = arith.constant 0 : i32
    return %arg0, %c0_i32, %c0_i32_0 : i32, i32, i32
  }
  func.func @transform_3(%arg0: i32) -> (i32, i32, i32) {
    %c0_i32 = arith.constant 0 : i32
    %c0_i32_0 = arith.constant 0 : i32
    %c0_i32_1 = arith.constant 0 : i32
    return %arg0, %c0_i32, %c0_i32_0 : i32, i32, i32
  }
  func.func @transform_4(%arg0: i32) -> (i32, i32, i32) {
    %c0_i32 = arith.constant 0 : i32
    %c0_i32_0 = arith.constant 0 : i32
    %c0_i32_1 = arith.constant 0 : i32
    return %arg0, %c0_i32, %c0_i32_0 : i32, i32, i32
  }
  func.func @transform_5(%arg0: i32) -> (i32, i32, i32) {
    %c0_i32 = arith.constant 0 : i32
    %c0_i32_0 = arith.constant 0 : i32
    %c0_i32_1 = arith.constant 0 : i32
    return %arg0, %c0_i32, %c0_i32_0 : i32, i32, i32
  }
  func.func @transform_6(%arg0: i32) -> (i32, i32, i32) {
    %c0_i32 = arith.constant 0 : i32
    %c0_i32_0 = arith.constant 0 : i32
    %c0_i32_1 = arith.constant 0 : i32
    return %arg0, %c0_i32, %c0_i32_0 : i32, i32, i32
  }
  func.func @transform_7(%arg0: i32) -> (i32, i32, i32) {
    %c0_i32 = arith.constant 0 : i32
    %c0_i32_0 = arith.constant 0 : i32
    %c0_i32_1 = arith.constant 0 : i32
    return %arg0, %c0_i32, %c0_i32_0 : i32, i32, i32
  }
}

</mosaic_0001>

<bundles_post_ra>
// kernel: tpu_custom_call.1
= control target key start
LH: loop header
LB: loop body
LE: loop exit
PB: predicated region body
PF: predicated region fallthrough
CT: control target
= control target key end

     0   :  { %s5321_s0 = inlined_call_operand.hbm [shape: f32[8,5], index: 0, kind: input, shape index: {}]   ;;  %s5322_s1 = inlined_call_operand.vmem [shape: bf16[2,5,800], index: 1, kind: input, shape index: {}]   ;;  %s5323_s2 = inlined_call_operand.hbm [shape: f32[2,1,800], index: 2, kind: input, shape index: {}]   ;;  %s5324_s3 = inlined_call_operand.hbm [shape: bf16[2,800,600], index: 3, kind: input, shape index: {}]   ;;  %s5325_s4 = inlined_call_operand.hbm [shape: f32[2,1,600], index: 4, kind: input, shape index: {}]   ;;  %s5326_s5 = inlined_call_operand.hbm [shape: f32[2,1,600], index: 5, kind: input, shape index: {}]   ;;  %s5327_s6 = inlined_call_operand.vmem [shape: f32[2,1,1], index: 6, kind: input, shape index: {}]   ;;  %s5328_s7 = inlined_call_operand.vmem [shape: f32[2,8,1], index: 7, kind: output, shape index: {}]  }
   0x1   :  { %5331 = sst [smem:[#allocation14_spill]] %s5321_s0 }
   0x2   :  { %5332 = sst [smem:[#allocation15_spill]] %s5323_s2 }
   0x3   :  { %5333 = sst [smem:[#allocation16_spill]] %s5325_s4 }
   0x4   :  { %12 = vsyncpa [#allocation3], 0 }
   0x5   :  { %13 = vsyncpa [#allocation5], 0 }
   0x6   :  { %15 = vsyncpa [#allocation5 + $0x1], 0 }
   0x7   :  { %16 = vsyncpa [#allocation8], 0 }
   0x8   :  { %18 = vsyncpa [#allocation8 + $0x1], 0  ;;  %s4496_s24 = smov 0   ;;  %s4498_s25 = smov 0  }
   0x9   :  { %s4500_s26 = smov 0   ;;  %s4502_s27 = smov 0  }
   0xa LB: > { %s4517_s28 = sadd.s32 1, %s4450_s27   ;;  %s78_s29 = sadd.s32 1, %s4446_s26  ;;  %s4450_s27 = sphi %s4502_s27, %s5347_s27   ;;  %s4446_s26 = sphi %s4500_s26, %s5346_s26   ;;  %s4442_s25 = sphi %s4498_s25, %s5345_s25   ;;  %s4438_s24 = sphi %s4496_s24, %s5344_s24  }
   0xb   : > { %s75_s30 = ssub.s32 %s4450_s27, %s4517_s28  ;;  %p85_p0 = scmp.ne.s32.totalorder %s4446_s26, %s4442_s25 }
   0xc   : > { %p76_p1 = scmp.eq.s32.totalorder %s75_s30, 0  ;;  %p86_p2 = scmp.eq.s32.totalorder %s4450_s27, 0 }
   0xd   : > { %p4219_p3 = scmp.lt.s32.totalorder %s4450_s27, 2  ;;  %s265_s9 = sand.u32 1, %s4450_s27  }
   0xe   : > { %s4527_s8 = scalar_select %p76_p1, %s4446_s26, %s78_s29  }
   0xf   : > { %p87_p4 = por %p86_p2, %p85_p0  ;;  %s4531_s10 = sand.u32 1, %s4446_s26  }
  0x10   : > { %5334 = sst [smem:[#allocation13_spill]] %s4527_s8  ;;  %s4177_s11 = smul.u32 7, %s4531_s10 }
  0x11   : > { %p4534_p5 = pnand %p4219_p3, %p87_p4  ;;  %s4178_s13 = smul.u32 7, %s4450_s27 }
  0x12   : > { %s5336_s2 = sld [smem:[#allocation15_spill]]  ;;  %s269_s17 = scalar_lea.vmem [#allocation4], %s4177_s11 }
  0x13   : > { %s277_s18 = sshll.u32 %s269_s17, 4  ;;  %s4179_s20 = smul.u32 2000, %s4531_s10  ;;  %s278_s18 = int_to_ptr.vmem [resolvable:$true] %s277_s18 }
  0x14   : > { %s4545_s21 = scalar_lea.sflag [#allocation5], %s265_s9  ;;  %p4262_p7 = pneg %p4534_p5 }
  0x18   : > { %s273_s16 = scalar_lea.hbm %s5336_s2, %s4178_s13  ;;  %s4265_s11 = scalar_lea.hbm %s5336_s2, 14 }
  0x19   : > { %s275_s19 = sshll.u32 %s273_s16, 4  ;;  %s276_s19 = int_to_ptr.hbm [resolvable:$true] %s275_s19 }
  0x1a   : > { %s4258_s22 = sshra.s32 %s276_s19, 4  ;;  %s4259_s22 = int_to_ptr.hbm [resolvable:$true] %s4258_s22 }
  0x1b   : > { %s4260_s23 = scalar_lea.hbm %s4259_s22, 7  ;;  %p4266_p10 = scmp.lt.s32.totalorder %s4259_s22, %s5336_s2 }
  0x1c   : > { %p4261_p6 = scmp.ne.s32.totalorder %s4259_s22, %s4260_s23  ;;  %p4267_p11 = scmp.lt.s32.totalorder %s4265_s11, %s4260_s23 }
  0x1e   : > { %p4263_p8 = pnand %p4262_p7, %p4261_p6  ;;  %p4268_p12 = por %p4267_p11, %p4266_p10 }
  0x20   : > { %p4264_p9 = pneg %p4263_p8 }
  0x22   : > { %p4269_p13 = pnand %p4268_p12, %p4264_p9 }
  0x24   : > { %4272 = shalt.err (!%p4269_p13)
}
  0x25   : > { %4208 = dma.hbm_to_vmem [thread:$0]  (!%p4534_p5), %s276_s19, 112, %s278_s18, %s4545_s21  }
  0x26   : > { %s5329_s15 = smul.u32 5, %s4531_s10  ;;  %s288_s16 = scalar_lea.vmem [#allocation6], %s4179_s20 }
  0x27   : > { %s296_s17 = sshll.u32 %s288_s16, 4  ;;  %s5330_s29 = smul.u32 5, %s4450_s27  ;;  %s4563_s17 = int_to_ptr.vmem [resolvable:$true] %s296_s17 }
  0x28   : > { %s5337_s4 = sld [smem:[#allocation16_spill]]  ;;  %s310_s11 = scalar_lea.vmem [#allocation7], %s5329_s15 }
  0x29   : > { %s318_s13 = sshll.u32 %s310_s11, 4  ;;  %s4574_s18 = scalar_lea.sflag [#allocation8], %s265_s9  ;;  %s319_s13 = int_to_ptr.vmem [resolvable:$true] %s318_s13 }
  0x2e   : > { %s314_s30 = scalar_lea.hbm %s5337_s4, %s5330_s29  ;;  %s4295_s23 = scalar_lea.hbm %s5337_s4, 10 }
  0x2f   : > { %s316_s14 = sshll.u32 %s314_s30, 4  ;;  %s317_s14 = int_to_ptr.hbm [resolvable:$true] %s316_s14 }
  0x30   : > { %s4288_s19 = sshra.s32 %s317_s14, 4  ;;  %s4289_s19 = int_to_ptr.hbm [resolvable:$true] %s4288_s19 }
  0x31   : > { %s4290_s20 = scalar_lea.hbm %s4289_s19, 5  ;;  %p4296_p3 = scmp.lt.s32.totalorder %s4289_s19, %s5337_s4 }
  0x32   : > { %p4291_p0 = scmp.ne.s32.totalorder %s4289_s19, %s4290_s20  ;;  %p4297_p4 = scmp.lt.s32.totalorder %s4295_s23, %s4290_s20 }
  0x34   : > { %p4293_p1 = pnand %p4291_p0, %p4262_p7  ;;  %p4298_p6 = por %p4297_p4, %p4296_p3 }
  0x36   : > { %p4294_p2 = pneg %p4293_p1 }
  0x38   : > { %p4299_p8 = pnand %p4298_p6, %p4294_p2 }
  0x3a   : > { %4302 = shalt.err (!%p4299_p8)
}
  0x3b   : > { %4214 = dma.hbm_to_vmem [thread:$0]  (!%p4534_p5), %s317_s14, 80, %s319_s13, %s4574_s18  }
  0x3c   : > { %s4589_s9 = sadd.s32 4294967295, %s4450_s27   ;;  %p91_p9 = scmp.ne.s32.totalorder %s4442_s25, %s4438_s24 }
  0x3d   : > { %p92_p10 = scmp.eq.s32.totalorder %s4589_s9, 0  ;;  %p2905_p11 = scmp.ge.s32.totalorder %s4450_s27, 1 }
  0x3e   : > { %p232_p12 = scmp.lt.s32.totalorder %s4450_s27, 3  ;;  %s5340_s0 = sld [smem:[#allocation14_spill]] }
  0x3f   : > { %p4598_p13 = por %p92_p10, %p91_p9  ;;  %s4452_s24 = smov [#allocation2]  }
  0x40   : > { %p4602_p0 = pnand %p2905_p11, %p232_p12  ;;  %s246_s20 = sshll.u32 %s4452_s24, 4  ;;  %s247_s20 = int_to_ptr.vmem [resolvable:$true] %s246_s20 }
  0x41   : > { %s4180_s16 = smul.u32 2000, %s4450_s27  ;;  %s4355_s2 = scalar_lea.hbm %s5324_s3, 4000 }
  0x42   : > { %p4201_p1 = pneg %p4602_p0 }
  0x43   : > { %s293_s11 = scalar_lea.hbm %s5324_s3, %s4180_s16 }
  0x44   : > { %s244_s14 = sshll.u32 %s5340_s0, 4  ;;  %p4202_p2 = pnand %p4201_p1, %p92_p10  ;;  %s245_s14 = int_to_ptr.hbm [resolvable:$true] %s244_s14 }
  0x45   : > { %s294_s29 = sshll.u32 %s293_s11, 4  ;;  %s295_s29 = int_to_ptr.hbm [resolvable:$true] %s294_s29 }
  0x46   : > { %4204 = dma.hbm_to_vmem [thread:$0]  (!%p4202_p2), %s245_s14, 128, %s247_s20, [#allocation3]  }
  0x47   : > { %s4348_s19 = sshra.s32 %s295_s29, 4  ;;  %s4349_s19 = int_to_ptr.hbm [resolvable:$true] %s4348_s19 }
  0x48   : > { %s4350_s13 = scalar_lea.hbm %s4349_s19, 2000  ;;  %p4356_p8 = scmp.lt.s32.totalorder %s4349_s19, %s5324_s3 }
  0x49   : > { %p4351_p3 = scmp.ne.s32.totalorder %s4349_s19, %s4350_s13  ;;  %p4357_p9 = scmp.lt.s32.totalorder %s4355_s2, %s4350_s13 }
  0x4b   : > { %p4353_p4 = pnand %p4351_p3, %p4262_p7  ;;  %p4358_p11 = por %p4357_p9, %p4356_p8 }
  0x4d   : > { %p4354_p6 = pneg %p4353_p4 }
  0x4f   : > { %p4359_p12 = pnand %p4358_p11, %p4354_p6 }
  0x51   : > { %4362 = shalt.err (!%p4359_p12)
}
  0x52   : > { %s4453_s14 = smov 320   ;;  %s4454_s20 = smov 20  }
  0x53   : > { %4211 = dma.hbm_to_vmem [thread:$0]  (!%p4534_p5), %s295_s29, 32000, %s4563_s17, %s4545_s21, %s4453_s14, %s4453_s14, %s4454_s20  }
  0x54   : > { %s5341_s0 = smul.u32 5, %s4450_s27  ;;  %s4385_s17 = scalar_lea.hbm %s5326_s5, 10 }
  0x55   : > { %s5342_s8 = smul.u32 5, %s4531_s10 }
  0x56   : > { %s333_s4 = scalar_lea.hbm %s5326_s5, %s5341_s0 }
  0x57   : > { %s329_s2 = scalar_lea.vmem [#allocation9], %s5342_s8  ;;  %s335_s11 = sshll.u32 %s333_s4, 4  ;;  %s336_s11 = int_to_ptr.hbm [resolvable:$true] %s335_s11 }
  0x58   : > { %s337_s23 = sshll.u32 %s329_s2, 4  ;;  %s4378_s19 = sshra.s32 %s336_s11, 4  ;;  %s338_s23 = int_to_ptr.vmem [resolvable:$true] %s337_s23  ;;  %s4379_s19 = int_to_ptr.hbm [resolvable:$true] %s4378_s19 }
  0x59   : > { %s4380_s13 = scalar_lea.hbm %s4379_s19, 5  ;;  %p4386_p4 = scmp.lt.s32.totalorder %s4379_s19, %s5326_s5 }
  0x5a   : > { %p4381_p1 = scmp.ne.s32.totalorder %s4379_s19, %s4380_s13  ;;  %p4387_p6 = scmp.lt.s32.totalorder %s4385_s17, %s4380_s13 }
  0x5c   : > { %p4383_p2 = pnand %p4381_p1, %p4262_p7  ;;  %p4388_p8 = por %p4387_p6, %p4386_p4 }
  0x5e   : > { %p4384_p3 = pneg %p4383_p2 }
  0x60   : > { %p4389_p9 = pnand %p4388_p8, %p4384_p3 }
  0x62   : > { %4392 = shalt.err (!%p4389_p9)
}
  0x63   : > { %4217 = dma.hbm_to_vmem [thread:$0]  (!%p4534_p5), %s336_s11, 80, %s338_s23, %s4574_s18  }
  0x64   : > { %352 = sbr.rel (%p4602_p0) target bundleno = 744 (0x2e8), region = 48 }
  0x69   : > { %4425 = dma.done.wait (%p92_p10), [#allocation3], 128  }
  0x6a   : > { %4427 = vsyncadd (%p92_p10), [#allocation3], 4294967168  ;;  %s359_s10 = sand.u32 1, %s4589_s9   ;;  %s4657_s14 = sand.u32 1, %s4442_s25  }
  0x6b   : > { %s4185_s20 = smul.u32 7, %s4657_s14  ;;  %s360_s12 = scalar_lea.sflag [#allocation5], %s359_s10 }
  0x6d   : > { %s4660_s0 = scalar_lea.vmem [#allocation4], %s4185_s20 }
  0x6e   : > { %4429 = dma.done.wait (%p4598_p13), %s360_s12, 32112  }
  0x6f   : > { %4431 = vsyncadd (%p4598_p13), %s360_s12, 4294935184  ;;  %s4186_s18 = smul.u32 2000, %s4657_s14  ;;  %s380_s22 = scalar_lea.sflag [#allocation8], %s359_s10 }
  0x70   : > { %s4187_s30 = smul.u32 5, %s4657_s14 }
  0x71   : > { %s4668_s16 = scalar_lea.vmem [#allocation6], %s4186_s18 }
  0x72   : > { %s4672_s4 = scalar_lea.vmem [#allocation7], %s4187_s30 }
  0x73   : > { %4433 = dma.done.wait (%p4598_p13), %s380_s22, 160  }
  0x74   : > { %4435 = vsyncadd (%p4598_p13), %s380_s22, 4294967136  ;;  %p447_p5 = scmp.lt.s32.totalorder %s4589_s9, 1  ;;  %vm504_vm0 = vcmask 1041408   ;;  %vm505_vm1 = vcmask 1042432   ;;  %v4455_v0 = vmov 65535   ;;  %v460_v17 = vld [vmem:[#allocation2] sm:$0xff] }
  0x75   : > { %v506_v1 = vsel %vm504_vm0, 4294967295, %v4455_v0  ;;  %v3222_v22 = vld [vmem:[%s4668_s16 + $0x258] sm:$0xf]  ;;  %v4004_v26 = vld [vmem:[%s4668_s16 + $0x268] sm:$0xf0]  ;;  %v4690_v29 = vpack.c.bf16 %v460_v17, %v460_v17  ;;  %vm500_vm2 = vcmask 39936  }
  0x76   : > { %s5349_s9 = smov (!%p447_p5, %s4589_s9), 1  ;;  %v507_v5 = vsel %vm505_vm1, %v506_v1, 0  ;;  %v3062_v27 = vld [vmem:[%s4668_s16 + $0x118] sm:$0xf]  ;;  %v3964_v28 = vld [vmem:[%s4668_s16 + $0x128] sm:$0xf0]  ;;  %v3223_v34 = vor.u32 %v4004_v26, %v3222_v22 }
  0x77   : > { %s4188_s8 = smul.u32 28, %s5349_s9  ;;  %v3202_v35 = vld [vmem:[%s4668_s16 + $0x230] sm:$0xf]  ;;  %v3999_v36 = vld [vmem:[%s4668_s16 + $0x240] sm:$0xf0]  ;;  %v3063_v37 = vor.u32 %v3964_v28, %v3062_v27  ;;  %vm2246_vm3 = vcmask 261120   ;;  %s454_s21 = scalar_lea.vmem %s5327_s6, %s5349_s9 }
  0x78   : > { %v3042_v38 = vld [vmem:[%s4668_s16 + $0xf0] sm:$0xf]  ;;  %v3959_v39 = vld [vmem:[%s4668_s16 + $0x100] sm:$0xf0]  ;;  %v3542_v40 = vld [vmem:[%s4668_s16 + $0x4d8] sm:$0xf]  ;;  %v3203_v45 = vor.u32 %v3999_v36, %v3202_v35 }
  0x79   : > { %s451_s11 = scalar_lea.vmem %s5322_s1, %s4188_s8  ;;  %v4084_v41 = vld [vmem:[%s4668_s16 + $0x4e8] sm:$0xf0]  ;;  %v3522_v43 = vld [vmem:[%s4668_s16 + $0x4b0] sm:$0xf]  ;;  %v4079_v44 = vld [vmem:[%s4668_s16 + $0x4c0] sm:$0xf0]  ;;  %v3043_v48 = vor.u32 %v3959_v39, %v3042_v38 }
  0x7a   : > { %v462_v2 = vld [vmem:[%s451_s11] sm:$0x77]  ;;  %v463_v3 = vld [vmem:[%s451_s11 + $0x8] sm:$0x77]  ;;  %v464_v8 = vld [vmem:[%s451_s11 + $0x10] sm:$0x77]  ;;  %v3543_v42 = vor.u32 %v4084_v41, %v3542_v40  ;;  %v3523_v51 = vor.u32 %v4079_v44, %v3522_v43 }
  0x7b   : > { %v486_v4 = vunpack.c.l.b16 %v462_v2  ;;  %v487_v6 = vunpack.c.h.b16 %v462_v2  ;;  %v488_v7 = vunpack.c.l.b16 %v463_v3  ;;  %v465_v9 = vld [vmem:[%s451_s11 + $0x18] sm:$0x7]  ;;  %v489_v10 = vunpack.c.h.b16 %v463_v3  ;;  %v3182_v46 = vld [vmem:[%s4668_s16 + $0x208] sm:$0xf]  ;;  %v3994_v47 = vld [vmem:[%s4668_s16 + $0x218] sm:$0xf0] }
  0x7c   : > { %v491_v11 = vunpack.c.h.b16 %v464_v8  ;;  %v492_v12 = vunpack.c.l.b16 %v465_v9  ;;  %v490_v13 = vunpack.c.l.b16 %v464_v8  ;;  %v3022_v49 = vld [vmem:[%s4668_s16 + $0xc8] sm:$0xf]  ;;  %v3954_v50 = vld [vmem:[%s4668_s16 + $0xd8] sm:$0xf0]  ;;  %v3382_v52 = vld [vmem:[%s4668_s16 + $0x398] sm:$0xf]  ;;  %v3183_v57 = vor.u32 %v3994_v47, %v3182_v46 }
  0x7d   : > { %v493_v14 = vpack.c.b16 %v486_v4, %v486_v4  ;;  %v494_v15 = vpack.c.b16 %v487_v6, %v487_v6  ;;  %v495_v16 = vpack.c.b16 %v488_v7, %v488_v7  ;;  %v496_v18 = vpack.c.b16 %v489_v10, %v489_v10  ;;  %v4044_v53 = vld [vmem:[%s4668_s16 + $0x3a8] sm:$0xf0]  ;;  %v3502_v54 = vld [vmem:[%s4668_s16 + $0x488] sm:$0xf]  ;;  %v4074_v55 = vld [vmem:[%s4668_s16 + $0x498] sm:$0xf0] }
  0x7e   : > { %v498_v19 = vpack.c.b16 %v491_v11, %v491_v11  ;;  %v499_v20 = vpack.c.b16 %v492_v12, %v492_v12  ;;  %v497_v21 = vpack.c.b16 %v490_v13, %v490_v13  ;;  %v3383_v56 = vor.u32 %v4044_v53, %v3382_v52  ;;  %v3162_v58 = vld [vmem:[%s4668_s16 + $0x1e0] sm:$0xf]  ;;  %v3362_v60 = vld [vmem:[%s4668_s16 + $0x370] sm:$0xf]  ;;  %v4039_v61 = vld [vmem:[%s4668_s16 + $0x380] sm:$0xf0] }
  0x7f   : > { %v509_v23 = vand.u32 %v507_v5, %v493_v14  ;;  %v512_v24 = vand.u32 %v507_v5, %v494_v15  ;;  %v515_v25 = vand.u32 %v507_v5, %v495_v16  ;;  %v518_v30 = vand.u32 %v507_v5, %v496_v18  ;;  %v3989_v62 = vld [vmem:[%s4668_s16 + $0x1f0] sm:$0xf0]  ;;  %v3002_v63 = vld [vmem:[%s4668_s16 + $0xa0] sm:$0xf]  ;;  %v4034_v6 = vld [vmem:[%s4668_s16 + $0x358] sm:$0xf0] }
  0x80   : > { %v524_v31 = vand.u32 %v507_v5, %v498_v19  ;;  %v527_v32 = vand.u32 %v507_v5, %v499_v20  ;;  %v521_v33 = vand.u32 %v507_v5, %v497_v21  ;;  %v3023_v59 = vor.u32 %v3954_v50, %v3022_v49  ;;  %v3949_v0 = vld [vmem:[%s4668_s16 + $0xb0] sm:$0xf0]  ;;  %v3482_v3 = vld [vmem:[%s4668_s16 + $0x460] sm:$0xf]  ;;  %v3342_v5 = vld [vmem:[%s4668_s16 + $0x348] sm:$0xf] }
  0x81   : > { %536 = vmatpush.bf16.msra.mxu3 %v509_v23  ;;  %549 = vmatpush.bf16.msra.mxu1 %v512_v24  ;;  %v3503_v1 = vor.u32 %v4074_v55, %v3502_v54  ;;  %v3363_v2 = vor.u32 %v4039_v61, %v3362_v60  ;;  %v4069_v4 = vld [vmem:[%s4668_s16 + $0x470] sm:$0xf0]  ;;  %v3163_v7 = vor.u32 %v3989_v62, %v3162_v58  ;;  %v3142_v8 = vld [vmem:[%s4668_s16 + $0x1b8] sm:$0xf]  ;;  %v3984_v9 = vld [vmem:[%s4668_s16 + $0x1c8] sm:$0xf0] }
  0x82   : > { %562 = vmatpush.bf16.msra.mxu2 %v515_v25  ;;  %588 = vmatpush.bf16.msra.mxu0 %v521_v33  ;;  %v3003_v10 = vor.u32 %v3949_v0, %v3002_v63  ;;  %v2982_v11 = vld [vmem:[%s4668_s16 + $0x78] sm:$0xf]  ;;  %v3944_v12 = vld [vmem:[%s4668_s16 + $0x88] sm:$0xf0]  ;;  %v3483_v13 = vor.u32 %v4069_v4, %v3482_v3  ;;  %v3343_v14 = vor.u32 %v4034_v6, %v3342_v5  ;;  %v3322_v17 = vld [vmem:[%s4668_s16 + $0x320] sm:$0xf] }
  0x83   : > { %v3462_v15 = vld [vmem:[%s4668_s16 + $0x438] sm:$0xf]  ;;  %v4064_v16 = vld [vmem:[%s4668_s16 + $0x448] sm:$0xf0]  ;;  %v4029_v18 = vld [vmem:[%s4668_s16 + $0x330] sm:$0xf0]  ;;  %v3143_v19 = vor.u32 %v3984_v9, %v3142_v8  ;;  %v2983_v22 = vor.u32 %v3944_v12, %v2982_v11 }
  0x84   : > { %2913 = vmatmul.msk.bf16.vlgmr.msra.gmra.mxu3 %vm500_vm2, %v4690_v29  ;;  %2914 = vmatmul.msk.bf16.vlgmr.msra.gmra.mxu1 %vm500_vm2, %v4690_v29  ;;  %v3122_v20 = vld [vmem:[%s4668_s16 + $0x190] sm:$0xf]  ;;  %v3979_v21 = vld [vmem:[%s4668_s16 + $0x1a0] sm:$0xf0]  ;;  %v3463_v25 = vor.u32 %v4064_v16, %v3462_v15  ;;  %v3323_v26 = vor.u32 %v4029_v18, %v3322_v17  ;;  %v3102_v33 = vld [vmem:[%s4668_s16 + $0x168] sm:$0xf] }
  0x85   : > { %575 = vmatpush.bf16.msrb.mxu3 %v518_v30  ;;  %601 = vmatpush.bf16.msrb.mxu1 %v524_v31  ;;  %v2962_v23 = vld [vmem:[%s4668_s16 + $0x50] sm:$0xf]  ;;  %v3939_v24 = vld [vmem:[%s4668_s16 + $0x60] sm:$0xf0]  ;;  %v3302_v30 = vld [vmem:[%s4668_s16 + $0x2f8] sm:$0xf] }
  0x86   : > { %614 = vmatpush.bf16.msrb.mxu2 %v527_v32  ;;  %2263 = vmatpush.bf16.msrb.mxu0 %v3223_v34  ;;  %v3442_v27 = vld [vmem:[%s4668_s16 + $0x410] sm:$0xf]  ;;  %v4059_v28 = vld [vmem:[%s4668_s16 + $0x420] sm:$0xf0]  ;;  %v4024_v31 = vld [vmem:[%s4668_s16 + $0x308] sm:$0xf0]  ;;  %v3123_v32 = vor.u32 %v3979_v21, %v3122_v20  ;;  %v2963_v35 = vor.u32 %v3939_v24, %v2962_v23 }
  0x87   : > { %2915 = vmatmul.msk.bf16.vlgmr.msra.gmra.mxu2 %vm500_vm2, %v4690_v29  ;;  %2917 = vmatmul.msk.bf16.vlgmr.msra.gmra.mxu0 %vm500_vm2, %v4690_v29  ;;  %v3974_v34 = vld [vmem:[%s4668_s16 + $0x178] sm:$0xf0]  ;;  %v2942_v36 = vld [vmem:[%s4668_s16 + $0x28] sm:$0xf]  ;;  %v3443_v38 = vor.u32 %v4059_v28, %v3442_v27  ;;  %v3303_v39 = vor.u32 %v4024_v31, %v3302_v30  ;;  %v3282_v41 = vld [vmem:[%s4668_s16 + $0x2d0] sm:$0xf] }
  0x88   : > { %v3422_v40 = vld [vmem:[%s4668_s16 + $0x3e8] sm:$0xf]  ;;  %v3103_v43 = vor.u32 %v3974_v34, %v3102_v33  ;;  %v3082_v44 = vld [vmem:[%s4668_s16 + $0x140] sm:$0xf]  ;;  %v3862_v47 = vld [vmem:[%s4668_s16 + $0x758] sm:$0xf] }
  0x89   : > { %2250 = vmatpush.bf16.msra.mxu3 %v3063_v37  ;;  %2276 = vmatpush.bf16.msra.mxu1 %v3383_v56  ;;  %v3934_v37 = vld [vmem:[%s4668_s16 + $0x38] sm:$0xf0]  ;;  %v3929_v49 = vld [vmem:[%s4668_s16 + $0x10] sm:$0xf0]  ;;  %v4164_v52 = vld [vmem:[%s4668_s16 + $0x768] sm:$0xf0] }
  0x8a   : > { %2289 = vmatpush.bf16.msra.mxu2 %v3543_v42  ;;  %2264 = vmatpush.bf16.msrb.mxu0 %v3203_v45  ;;  %v4019_v42 = vld [vmem:[%s4668_s16 + $0x2e0] sm:$0xf0]  ;;  %v3969_v45 = vld [vmem:[%s4668_s16 + $0x150] sm:$0xf0]  ;;  %v2943_v46 = vor.u32 %v3934_v37, %v2942_v36  ;;  %v3702_v53 = vld [vmem:[%s4668_s16 + $0x618] sm:$0xf] }
  0x8b   : > { %v4124_v54 = vld [vmem:[%s4668_s16 + $0x628] sm:$0xf0]  ;;  %v3402_v55 = vld [vmem:[%s4668_s16 + $0x3c0] sm:$0xf]  ;;  %v4049_v56 = vld [vmem:[%s4668_s16 + $0x3d0] sm:$0xf0] }
  0x8c   : > { %v3842_v60 = vld [vmem:[%s4668_s16 + $0x730] sm:$0xf]  ;;  %v3703_v61 = vor.u32 %v4124_v54, %v3702_v53  ;;  %v4159_v62 = vld [vmem:[%s4668_s16 + $0x740] sm:$0xf0]  ;;  %v3822_v3 = vld [vmem:[%s4668_s16 + $0x708] sm:$0xf] }
  0x8d   : > { %2251 = vmatpush.bf16.msra.mxu3 %v3043_v48  ;;  %2277 = vmatpush.bf16.msra.mxu1 %v3363_v2  ;;  %v2922_v48 = vld [vmem:[%s4668_s16] sm:$0xf]  ;;  %v3682_v63 = vld [vmem:[%s4668_s16 + $0x5f0] sm:$0xf]  ;;  %v4119_v0 = vld [vmem:[%s4668_s16 + $0x600] sm:$0xf0]  ;;  %v3843_v2 = vor.u32 %v4159_v62, %v3842_v60 }
  0x8e   : > { %2290 = vmatpush.bf16.msra.mxu2 %v3523_v51  ;;  %2265 = vmatpush.bf16.msrb.mxu0 %v3183_v57  ;;  %v3283_v51 = vor.u32 %v4019_v42, %v3282_v41  ;;  %v3083_v57 = vor.u32 %v3969_v45, %v3082_v44  ;;  %v2923_v58 = vor.u32 %v3929_v49, %v2922_v48  ;;  %v4154_v5 = vld [vmem:[%s4668_s16 + $0x718] sm:$0xf0]  ;;  %v3662_v6 = vld [vmem:[%s4668_s16 + $0x5c8] sm:$0xf]  ;;  %v3802_v9 = vld [vmem:[%s4668_s16 + $0x6e0] sm:$0xf] }
  0x8f   : > { %v3683_v4 = vor.u32 %v4119_v0, %v3682_v63  ;;  %v3823_v8 = vor.u32 %v4154_v5, %v3822_v3  ;;  %v4149_v11 = vld [vmem:[%s4668_s16 + $0x6f0] sm:$0xf0]  ;;  %v3642_v12 = vld [vmem:[%s4668_s16 + $0x5a0] sm:$0xf]  ;;  %v3782_v16 = vld [vmem:[%s4668_s16 + $0x6b8] sm:$0xf] }
  0x90   : > { %v4144_v17 = vld [vmem:[%s4668_s16 + $0x6c8] sm:$0xf0]  ;;  %v4139_v20 = vld [vmem:[%s4668_s16 + $0x6a0] sm:$0xf0]  ;;  %v3962_v24 = vld [vmem:[%s4668_s16 + $0x11c] sm:$0xf] }
  0x91   : > { %2252 = vmatpush.bf16.msra.mxu3 %v3023_v59  ;;  %2278 = vmatpush.bf16.msra.mxu1 %v3343_v14  ;;  %v3863_v59 = vor.u32 %v4164_v52, %v3862_v47  ;;  %v3803_v14 = vor.u32 %v4149_v11, %v3802_v9  ;;  %v3783_v18 = vor.u32 %v4144_v17, %v3782_v16  ;;  %v4104_v23 = vld [vmem:[%s4668_s16 + $0x588] sm:$0xf0]  ;;  %v3742_v28 = vld [vmem:[%s4668_s16 + $0x668] sm:$0xf]  ;;  %v4134_v30 = vld [vmem:[%s4668_s16 + $0x678] sm:$0xf0] }
  0x92   : > { %2291 = vmatpush.bf16.msra.mxu2 %v3503_v1  ;;  %2266 = vmatpush.bf16.msrb.mxu0 %v3163_v7  ;;  %v3403_v1 = vor.u32 %v4049_v56, %v3402_v55  ;;  %v4114_v7 = vld [vmem:[%s4668_s16 + $0x5d8] sm:$0xf0]  ;;  %v3743_v31 = vor.u32 %v4134_v30, %v3742_v28  ;;  %v4099_v36 = vld [vmem:[%s4668_s16 + $0x560] sm:$0xf0]  ;;  %v3957_v37 = vld [vmem:[%s4668_s16 + $0xf4] sm:$0xf] }
  0x93   : > { %v4014_v33 = vld [vmem:[%s4668_s16 + $0x2b8] sm:$0xf0]  ;;  %v4129_v41 = vld [vmem:[%s4668_s16 + $0x650] sm:$0xf0]  ;;  %v3902_v48 = vld [vmem:[%s4668_s16 + $0x7a8] sm:$0xf] }
  0x94   : > { %2916 = vmatmul.msk.bf16.vlgmr.msrb.gmra.mxu3 %vm500_vm2, %v4690_v29  ;;  %2918 = vmatmul.msk.bf16.vlgmr.msrb.gmra.mxu1 %vm500_vm2, %v4690_v29  ;;  %v4009_v44 = vld [vmem:[%s4668_s16 + $0x290] sm:$0xf0]  ;;  %v4094_v47 = vld [vmem:[%s4668_s16 + $0x538] sm:$0xf0]  ;;  %v3024_v52 = vld [vmem:[%s4668_s16 + $0xdc] sm:$0xf0] }
  0x95   : > { %2253 = vmatpush.bf16.msra.mxu3 %v3003_v10  ;;  %2279 = vmatpush.bf16.msra.mxu1 %v3323_v26  ;;  %v3663_v10 = vor.u32 %v4114_v7, %v3662_v6  ;;  %v3064_v26 = vld [vmem:[%s4668_s16 + $0x12c] sm:$0xf0]  ;;  %v3562_v55 = vld [vmem:[%s4668_s16 + $0x500] sm:$0xf]  ;;  %v4089_v56 = vld [vmem:[%s4668_s16 + $0x510] sm:$0xf0] }
  0x96   : > { %2292 = vmatpush.bf16.msra.mxu2 %v3483_v13  ;;  %2267 = vmatpush.bf16.msrb.mxu0 %v3143_v19  ;;  %v4109_v13 = vld [vmem:[%s4668_s16 + $0x5b0] sm:$0xf0]  ;;  %v3762_v19 = vld [vmem:[%s4668_s16 + $0x690] sm:$0xf]  ;;  %v3067_v27 = vor.u32 %v3962_v24, %v3064_v26  ;;  %v3947_v60 = vld [vmem:[%s4668_s16 + $0xa4] sm:$0xf] }
  0x97   : > { %2919 = vmatmul.msk.bf16.vlgmr.msrb.gmra.mxu2 %vm500_vm2, %v4690_v29  ;;  %v4054_v29 = vld [vmem:[%s4668_s16 + $0x3f8] sm:$0xf0]  ;;  %v3643_v15 = vor.u32 %v4109_v13, %v3642_v12  ;;  %v3763_v21 = vor.u32 %v4139_v20, %v3762_v19  ;;  %v3937_v3 = vld [vmem:[%s4668_s16 + $0x54] sm:$0xf]  ;;  %v3932_v6 = vld [vmem:[%s4668_s16 + $0x2c] sm:$0xf] }
  0x98   : > { %v3423_v50 = vor.u32 %v4054_v29, %v3422_v40  ;;  %v3722_v29 = vld [vmem:[%s4668_s16 + $0x640] sm:$0xf]  ;;  %v3942_v0 = vld [vmem:[%s4668_s16 + $0x7c] sm:$0xf]  ;;  %v4817_v9 = vld [vmem:[%s4660_s0] sm:$0x7f] }
  0x99   : > { %2254 = vmatpush.bf16.msra.mxu3 %v2983_v22  ;;  %2280 = vmatpush.bf16.msra.mxu1 %v3303_v39  ;;  %v3622_v22 = vld [vmem:[%s4668_s16 + $0x578] sm:$0xf]  ;;  %v3044_v39 = vld [vmem:[%s4668_s16 + $0x104] sm:$0xf0]  ;;  %v3723_v42 = vor.u32 %v4129_v41, %v3722_v29  ;;  %v2944_v7 = vld [vmem:[%s4668_s16 + $0x3c] sm:$0xf0] }
  0x9a   : > { %2293 = vmatpush.bf16.msra.mxu2 %v3463_v25  ;;  %2268 = vmatpush.bf16.msrb.mxu0 %v3123_v32  ;;  %v3623_v25 = vor.u32 %v4104_v23, %v3622_v22  ;;  %v3262_v32 = vld [vmem:[%s4668_s16 + $0x2a8] sm:$0xf]  ;;  %v3047_v40 = vor.u32 %v3957_v37, %v3044_v39  ;;  %v2924_v11 = vld [vmem:[%s4668_s16 + $0x14] sm:$0xf0]  ;;  %v469_v13 = vperm.slane %v4817_v9, 1  ;;  %v468_v19 = vperm.slane %v4817_v9, 0 }
  0x9b   : > { %v3263_v34 = vor.u32 %v4014_v33, %v3262_v32  ;;  %v4082_v16 = vld [vmem:[%s4668_s16 + $0x4dc] sm:$0xf]  ;;  %v3544_v17 = vld [vmem:[%s4668_s16 + $0x4ec] sm:$0xf0]  ;;  %v470_v20 = vperm.slane %v4817_v9, 2  ;;  %s393_s15 = scalar_lea.vmem [#allocation9], %s4187_s30 }
  0x9c   : > { %v4077_v24 = vld [vmem:[%s4668_s16 + $0x4b4] sm:$0xf]  ;;  %v4042_v30 = vld [vmem:[%s4668_s16 + $0x39c] sm:$0xf]  ;;  %v3504_v39 = vld [vmem:[%s4668_s16 + $0x49c] sm:$0xf0] }
  0x9d   : > { %2255 = vmatpush.bf16.msra.mxu3 %v2963_v35  ;;  %2281 = vmatpush.bf16.msra.mxu1 %v3283_v51  ;;  %v3602_v35 = vld [vmem:[%s4668_s16 + $0x550] sm:$0xf]  ;;  %v3952_v51 = vld [vmem:[%s4668_s16 + $0xcc] sm:$0xf]  ;;  %vm2730_vm4 = vcmask 719872   ;;  %s2912_s29 = sshll.u32 %s5349_s9, 3 }
  0x9e   : > { %2294 = vmatpush.bf16.msra.mxu2 %v3443_v38  ;;  %2269 = vmatpush.bf16.msrb.mxu0 %v3103_v43  ;;  %v3603_v38 = vor.u32 %v4099_v36, %v3602_v35  ;;  %v3242_v43 = vld [vmem:[%s4668_s16 + $0x280] sm:$0xf]  ;;  %v3027_v54 = vor.u32 %v3952_v51, %v3024_v52  ;;  %v4002_v35 = vld [vmem:[%s4668_s16 + $0x25c] sm:$0xf]  ;;  %v3224_v36 = vld [vmem:[%s4668_s16 + $0x26c] sm:$0xf0]  ;;  %s458_s14 = scalar_lea.vmem %s5328_s7, %s2912_s29 }
  0x9f   : > { %v3243_v45 = vor.u32 %v4009_v44, %v3242_v43  ;;  %v4037_v43 = vld [vmem:[%s4668_s16 + $0x374] sm:$0xf]  ;;  %v3364_v44 = vld [vmem:[%s4668_s16 + $0x384] sm:$0xf0]  ;;  %v4067_v51 = vld [vmem:[%s4668_s16 + $0x464] sm:$0xf] }
  0xa0   : > { %v3484_v52 = vld [vmem:[%s4668_s16 + $0x474] sm:$0xf0]  ;;  %vm2741_vm5 = vcmask 7168  }
  0xa1   : > { %2256 = vmatpush.bf16.msra.mxu3 %v2943_v46  ;;  %2282 = vmatpush.bf16.msra.mxu1 %v3263_v34  ;;  %v3582_v46 = vld [vmem:[%s4668_s16 + $0x528] sm:$0xf] }
  0xa2   : > { %2295 = vmatpush.bf16.msra.mxu2 %v3423_v50  ;;  %2270 = vmatpush.bf16.msrb.mxu0 %v3083_v57  ;;  %v3583_v49 = vor.u32 %v4094_v47, %v3582_v46  ;;  %v4174_v50 = vld [vmem:[%s4668_s16 + $0x7b8] sm:$0xf0]  ;;  %v3882_v57 = vld [vmem:[%s4668_s16 + $0x780] sm:$0xf]  ;;  %v3997_v47 = vld [vmem:[%s4668_s16 + $0x234] sm:$0xf] }
  0xa3   : > { %v3903_v53 = vor.u32 %v4174_v50, %v3902_v48  ;;  %v3204_v48 = vld [vmem:[%s4668_s16 + $0x244] sm:$0xf0]  ;;  %v473_v50 = vperm.slane %v4817_v9, 5 }
  0xa5   : > { %2257 = vmatpush.bf16.msra.mxu3 %v2923_v58  ;;  %2283 = vmatpush.bf16.msra.mxu1 %v3243_v45  ;;  %v3563_v58 = vor.u32 %v4089_v56, %v3562_v55  ;;  %v3367_v55 = vor.u32 %v4037_v43, %v3364_v44  ;;  %v3977_v43 = vld [vmem:[%s4668_s16 + $0x194] sm:$0xf] }
  0xa6   : > { %2315 = vmatpush.bf16.msra.mxu0 %v3863_v59  ;;  %2296 = vmatpush.bf16.msra.mxu2 %v3403_v1  ;;  %v4169_v59 = vld [vmem:[%s4668_s16 + $0x790] sm:$0xf0]  ;;  %v2984_v1 = vld [vmem:[%s4668_s16 + $0x8c] sm:$0xf0] }
  0xa7   : > { %v3883_v62 = vor.u32 %v4169_v59, %v3882_v57  ;;  %v3207_v57 = vor.u32 %v3997_v47, %v3204_v48  ;;  %v3344_v59 = vld [vmem:[%s4668_s16 + $0x35c] sm:$0xf0]  ;;  %v4017_v44 = vld [vmem:[%s4668_s16 + $0x2d4] sm:$0xf] }
  0xa9   : > { %2302 = vmatpush.bf16.msrb.mxu3 %v3703_v61  ;;  %2334 = vmatpush.bf16.msrb.mxu1 %v3903_v53  ;;  %v3004_v61 = vld [vmem:[%s4668_s16 + $0xb4] sm:$0xf0]  ;;  %v472_v53 = vperm.slane %v4817_v9, 4 }
  0xaa   : > { %2316 = vmatpush.bf16.msra.mxu0 %v3843_v2  ;;  %2341 = vmatpush.bf16.msrb.mxu2 %v3067_v27  ;;  %v3007_v63 = vor.u32 %v3947_v60, %v3004_v61  ;;  %v2987_v2 = vor.u32 %v3942_v0, %v2984_v1  ;;  %v3487_v61 = vor.u32 %v4067_v51, %v3484_v52  ;;  %v3684_v51 = vld [vmem:[%s4668_s16 + $0x604] sm:$0xf0]  ;;  %v4047_v52 = vld [vmem:[%s4668_s16 + $0x3c4] sm:$0xf] }
  0xad   : > { %2303 = vmatpush.bf16.msrb.mxu3 %v3683_v4  ;;  %2335 = vmatpush.bf16.msrb.mxu1 %v3883_v62  ;;  %v2964_v4 = vld [vmem:[%s4668_s16 + $0x64] sm:$0xf0]  ;;  %v3992_v62 = vld [vmem:[%s4668_s16 + $0x20c] sm:$0xf] }
  0xae   : > { %2317 = vmatpush.bf16.msra.mxu0 %v3823_v8  ;;  %2342 = vmatpush.bf16.msrb.mxu2 %v3047_v40  ;;  %v2967_v5 = vor.u32 %v3937_v3, %v2964_v4  ;;  %v2947_v8 = vor.u32 %v3932_v6, %v2944_v7  ;;  %v3464_v3 = vld [vmem:[%s4668_s16 + $0x44c] sm:$0xf0]  ;;  %v471_v7 = vperm.slane %v4817_v9, 3 }
  0xb1   : > { %2304 = vmatpush.bf16.msrb.mxu3 %v3663_v10  ;;  %v3927_v10 = vld [vmem:[%s4668_s16 + $0x4] sm:$0xf] }
  0xb2   : > { %2318 = vmatpush.bf16.msra.mxu0 %v3803_v14  ;;  %2343 = vmatpush.bf16.msrb.mxu2 %v3027_v54  ;;  %v2927_v12 = vor.u32 %v3927_v10, %v2924_v11  ;;  %v3324_v10 = vld [vmem:[%s4668_s16 + $0x334] sm:$0xf0]  ;;  %v474_v11 = vperm.slane %v4817_v9, 6 }
  0xb5   : > { %2305 = vmatpush.bf16.msrb.mxu3 %v3643_v15 }
  0xb6   : > { %2319 = vmatpush.bf16.msra.mxu0 %v3783_v18  ;;  %2344 = vmatpush.bf16.msrb.mxu2 %v3007_v63  ;;  %v3184_v63 = vld [vmem:[%s4668_s16 + $0x21c] sm:$0xf0] }
  0xb7   : > { %v3187_v6 = vor.u32 %v3992_v62, %v3184_v63  ;;  %v3264_v62 = vld [vmem:[%s4668_s16 + $0x2bc] sm:$0xf0] }
  0xb9   : > { %2306 = vmatpush.bf16.msrb.mxu3 %v3623_v25  ;;  %v3524_v25 = vld [vmem:[%s4668_s16 + $0x4c4] sm:$0xf0] }
  0xba   : > { %2320 = vmatpush.bf16.msra.mxu0 %v3763_v21  ;;  %2345 = vmatpush.bf16.msrb.mxu2 %v2987_v2  ;;  %v3547_v21 = vor.u32 %v4082_v16, %v3544_v17  ;;  %v3527_v34 = vor.u32 %v4077_v24, %v3524_v25  ;;  %v4062_v2 = vld [vmem:[%s4668_s16 + $0x43c] sm:$0xf]  ;;  %v4057_v17 = vld [vmem:[%s4668_s16 + $0x414] sm:$0xf] }
  0xbb   : > { %v3982_v24 = vld [vmem:[%s4668_s16 + $0x1bc] sm:$0xf] }
  0xbc   : > { %v4022_v25 = vld [vmem:[%s4668_s16 + $0x2fc] sm:$0xf] }
  0xbd   : > { %2307 = vmatpush.bf16.msrb.mxu3 %v3603_v38  ;;  %v4072_v38 = vld [vmem:[%s4668_s16 + $0x48c] sm:$0xf] }
  0xbe   : > { %2321 = vmatpush.bf16.msra.mxu0 %v3743_v31  ;;  %2346 = vmatpush.bf16.msrb.mxu2 %v2967_v5  ;;  %v3384_v31 = vld [vmem:[%s4668_s16 + $0x3ac] sm:$0xf0]  ;;  %v3507_v46 = vor.u32 %v4072_v38, %v3504_v39 }
  0xbf   : > { %v3387_v29 = vor.u32 %v4042_v30, %v3384_v31  ;;  %v3144_v30 = vld [vmem:[%s4668_s16 + $0x1cc] sm:$0xf0]  ;;  %v4122_v31 = vld [vmem:[%s4668_s16 + $0x61c] sm:$0xf] }
  0xc1   : > { %2308 = vmatpush.bf16.msrb.mxu3 %v3583_v49 }
  0xc2   : > { %2322 = vmatpush.bf16.msra.mxu0 %v3723_v42  ;;  %2347 = vmatpush.bf16.msrb.mxu2 %v2947_v8  ;;  %v3227_v42 = vor.u32 %v4002_v35, %v3224_v36  ;;  %v4027_v8 = vld [vmem:[%s4668_s16 + $0x324] sm:$0xf]  ;;  %v4052_v36 = vld [vmem:[%s4668_s16 + $0x3ec] sm:$0xf] }
  0xc5   : > { %2309 = vmatpush.bf16.msrb.mxu3 %v3563_v58  ;;  %v4032_v58 = vld [vmem:[%s4668_s16 + $0x34c] sm:$0xf] }
  0xc6   : > { %2348 = vmatpush.bf16.msrb.mxu2 %v2927_v12  ;;  %v3347_v4 = vor.u32 %v4032_v58, %v3344_v59  ;;  %v3467_v12 = vor.u32 %v4062_v2, %v3464_v3  ;;  %v4112_v2 = vld [vmem:[%s4668_s16 + $0x5cc] sm:$0xf]  ;;  %v3664_v3 = vld [vmem:[%s4668_s16 + $0x5dc] sm:$0xf0] }
 0x101   : > { %v551_v14 = vpop.f32.mrf.mxu1 }
 0x102   : > { %v552_v15 = vadd.f32 %v551_v14, %v469_v13  ;;  %v3987_v13 = vld [vmem:[%s4668_s16 + $0x1e4] sm:$0xf]  ;;  %v3164_v14 = vld [vmem:[%s4668_s16 + $0x1f4] sm:$0xf0] }
 0x104   : > { %v621_v18 = vmax.f32 %v552_v15, 0.0  ;;  %v590_v22 = vpop.f32.mrf.mxu0 }
 0x105   : > { %v591_v1 = vadd.f32 %v590_v22, %v472_v53  ;;  %v3167_v22 = vor.u32 %v3987_v13, %v3164_v14  ;;  %v3404_v53 = vld [vmem:[%s4668_s16 + $0x3d4] sm:$0xf0]  ;;  %v4007_v13 = vld [vmem:[%s4668_s16 + $0x284] sm:$0xf] }
 0x106   : > { %v4826_v23 = vpack.c.bf16 %v621_v18, %v621_v18  ;;  %v3444_v18 = vld [vmem:[%s4668_s16 + $0x424] sm:$0xf0]  ;;  %v3244_v14 = vld [vmem:[%s4668_s16 + $0x294] sm:$0xf0] }
 0x107   : > { %v538_v26 = vpop.f32.mrf.mxu3  ;;  %v624_v16 = vmax.f32 %v591_v1, 0.0  ;;  %v3104_v1 = vld [vmem:[%s4668_s16 + $0x17c] sm:$0xf0] }
 0x108   : > { %v539_v27 = vadd.f32 %v538_v26, %v468_v19  ;;  %2271 = vmatmul.bf16.vlgmr.msrb.gmra.mxu0 %v4826_v23  ;;  %v3304_v26 = vld [vmem:[%s4668_s16 + $0x30c] sm:$0xf0] }
 0x109   : > { %2380 = vmatpush.bf16.msrb.mxu0 %v3547_v21  ;;  %v553_v33 = vpop.f32.mrf.mxu1  ;;  %v4874_v35 = vpack.c.bf16 %v624_v16, %v624_v16  ;;  %v3307_v39 = vor.u32 %v4022_v25, %v3304_v26  ;;  %v4107_v16 = vld [vmem:[%s4668_s16 + $0x5a4] sm:$0xf] }
 0x10a   : > { %v564_v28 = vpop.f32.mrf.mxu2  ;;  %v620_v37 = vmax.f32 %v539_v27, 0.0  ;;  %v3955_v25 = vld [vmem:[%s4668_s16 + $0xe0] sm:$0xf0] }
 0x10b   : > { %v565_v32 = vadd.f32 %v564_v28, %v470_v20  ;;  %v3327_v20 = vor.u32 %v4027_v8, %v3324_v10  ;;  %v3447_v28 = vor.u32 %v4057_v17, %v3444_v18  ;;  %v3967_v8 = vld [vmem:[%s4668_s16 + $0x144] sm:$0xf]  ;;  %v3644_v17 = vld [vmem:[%s4668_s16 + $0x5b4] sm:$0xf0]  ;;  %v4162_v18 = vld [vmem:[%s4668_s16 + $0x75c] sm:$0xf] }
 0x10c   : > { %v4837_v41 = vpack.c.bf16 %v620_v37, %v620_v37  ;;  %v592_v49 = vpop.f32.mrf.mxu0  ;;  %v3424_v37 = vld [vmem:[%s4668_s16 + $0x3fc] sm:$0xf0] }
 0x10d   : > { %v622_v40 = vmax.f32 %v565_v32, 0.0  ;;  %2381 = vmatpush.bf16.msrb.mxu0 %v3527_v34  ;;  %v3704_v32 = vld [vmem:[%s4668_s16 + $0x62c] sm:$0xf0]  ;;  %v3427_v48 = vor.u32 %v4052_v36, %v3424_v37  ;;  %v3124_v49 = vld [vmem:[%s4668_s16 + $0x1a4] sm:$0xf0] }
 0x10e   : > { %2258 = vmatmul.bf16.vlgmr.msra.gmra.mxu3 %v4837_v41  ;;  %v3127_v58 = vor.u32 %v3977_v43, %v3124_v49  ;;  %v4167_v37 = vld [vmem:[%s4668_s16 + $0x784] sm:$0xf]  ;;  %v3950_v43 = vld [vmem:[%s4668_s16 + $0xb8] sm:$0xf0]  ;;  %v4097_v49 = vld [vmem:[%s4668_s16 + $0x554] sm:$0xf] }
 0x10f   : > { %v4841_v45 = vpack.c.bf16 %v622_v40, %v622_v40  ;;  %2367 = vmatpush.bf16.msra.mxu3 %v3387_v29  ;;  %v540_v54 = vpop.f32.mrf.mxu3  ;;  %v3147_v29 = vor.u32 %v3982_v24, %v3144_v30  ;;  %v3030_v24 = vld [vmem:[%s4668_s16 + $0xd0] sm:$0xf] }
 0x110   : > { %v3031_v36 = vor.u32 %v3955_v25, %v3030_v24 }
 0x111   : > { %2284 = vmatmul.bf16.vlgmr.msra.gmra.mxu1 %v4841_v45  ;;  %2382 = vmatpush.bf16.msrb.mxu0 %v3507_v46  ;;  %v603_v60 = vpop.f32.mrf.mxu1  ;;  %v3284_v46 = vld [vmem:[%s4668_s16 + $0x2e4] sm:$0xf0] }
 0x112   : > { %2354 = vmatpush.bf16.msra.mxu1 %v3227_v42  ;;  %v566_v56 = vpop.f32.mrf.mxu2  ;;  %v604_v0 = vadd.f32 %v603_v60, %v473_v50  ;;  %v3707_v42 = vor.u32 %v4122_v31, %v3704_v32  ;;  %v4117_v50 = vld [vmem:[%s4668_s16 + $0x5f4] sm:$0xf]  ;;  %v3972_v60 = vld [vmem:[%s4668_s16 + $0x16c] sm:$0xf]  ;;  %v3624_v32 = vld [vmem:[%s4668_s16 + $0x58c] sm:$0xf0] }
 0x113   : > { %2368 = vmatpush.bf16.msra.mxu3 %v3367_v55  ;;  %v3287_v55 = vor.u32 %v4017_v44, %v3284_v46  ;;  %v3070_v56 = vld [vmem:[%s4668_s16 + $0x120] sm:$0xf]  ;;  %v3687_v59 = vor.u32 %v4117_v50, %v3684_v51  ;;  %v3107_v10 = vor.u32 %v3972_v60, %v3104_v1  ;;  %v3604_v50 = vld [vmem:[%s4668_s16 + $0x564] sm:$0xf0]  ;;  %v4147_v1 = vld [vmem:[%s4668_s16 + $0x6e4] sm:$0xf] }
 0x114   : > { %v625_v5 = vmax.f32 %v604_v0, 0.0  ;;  %v3407_v0 = vor.u32 %v4047_v52, %v3404_v53  ;;  %v4152_v53 = vld [vmem:[%s4668_s16 + $0x70c] sm:$0xf] }
 0x115   : > { %2383 = vmatpush.bf16.msrb.mxu0 %v3487_v61  ;;  %v4012_v61 = vld [vmem:[%s4668_s16 + $0x2ac] sm:$0xf] }
 0x116   : > { %2355 = vmatpush.bf16.msra.mxu1 %v3207_v57  ;;  %v4863_v15 = vpack.c.bf16 %v625_v5, %v625_v5  ;;  %v3965_v57 = vld [vmem:[%s4668_s16 + $0x130] sm:$0xf0]  ;;  %v3267_v5 = vor.u32 %v4012_v61, %v3264_v62  ;;  %v4092_v61 = vld [vmem:[%s4668_s16 + $0x52c] sm:$0xf]  ;;  %v3584_v62 = vld [vmem:[%s4668_s16 + $0x53c] sm:$0xf0] }
 0x117   : > { %2369 = vmatpush.bf16.msra.mxu3 %v3347_v4  ;;  %v577_v19 = vpop.f32.mrf.mxu3  ;;  %v3071_v4 = vor.u32 %v3965_v57, %v3070_v56  ;;  %v4040_v56 = vld [vmem:[%s4668_s16 + $0x388] sm:$0xf0]  ;;  %v2990_v57 = vld [vmem:[%s4668_s16 + $0x80] sm:$0xf] }
 0x118   : > { %v578_v21 = vadd.f32 %v577_v19, %v471_v7  ;;  %2323 = vmatmul.bf16.vlgmr.msra.gmra.mxu0 %v4863_v15  ;;  %v3960_v7 = vld [vmem:[%s4668_s16 + $0x108] sm:$0xf0] }
 0x119   : > { %2384 = vmatpush.bf16.msrb.mxu0 %v3467_v12  ;;  %v605_v33 = vpop.f32.mrf.mxu1  ;;  %v3084_v12 = vld [vmem:[%s4668_s16 + $0x154] sm:$0xf0] }
 0x11a   : > { %2356 = vmatpush.bf16.msra.mxu1 %v3187_v6  ;;  %v616_v9 = vpop.f32.mrf.mxu2  ;;  %v623_v34 = vmax.f32 %v578_v21, 0.0  ;;  %v3050_v6 = vld [vmem:[%s4668_s16 + $0xf8] sm:$0xf]  ;;  %v4172_v21 = vld [vmem:[%s4668_s16 + $0x7ac] sm:$0xf]  ;;  %v3087_v26 = vor.u32 %v3967_v8, %v3084_v12 }
 0x11b   : > { %v617_v27 = vadd.f32 %v616_v9, %v474_v11  ;;  %2370 = vmatpush.bf16.msra.mxu3 %v3327_v20  ;;  %v3667_v11 = vor.u32 %v4112_v2, %v3664_v3  ;;  %v3051_v19 = vor.u32 %v3960_v7, %v3050_v6  ;;  %v3864_v20 = vld [vmem:[%s4668_s16 + $0x76c] sm:$0xf0]  ;;  %v3904_v9 = vld [vmem:[%s4668_s16 + $0x7bc] sm:$0xf0]  ;;  %v4157_v33 = vld [vmem:[%s4668_s16 + $0x734] sm:$0xf]  ;;  %v3587_v7 = vor.u32 %v4092_v61, %v3584_v62 }
 0x11c   : > { %v4878_v40 = vpack.c.bf16 %v623_v34, %v623_v34  ;;  %v3867_v30 = vor.u32 %v4162_v18, %v3864_v20  ;;  %v3907_v31 = vor.u32 %v4172_v21, %v3904_v9  ;;  %v3844_v34 = vld [vmem:[%s4668_s16 + $0x744] sm:$0xf0]  ;;  %v3804_v2 = vld [vmem:[%s4668_s16 + $0x6f4] sm:$0xf0]  ;;  %v3350_v3 = vld [vmem:[%s4668_s16 + $0x350] sm:$0xf] }
 0x11d   : > { %v626_v38 = vmax.f32 %v617_v27, 0.0  ;;  %2385 = vmatpush.bf16.msrb.mxu0 %v3447_v28  ;;  %v3647_v27 = vor.u32 %v4107_v16, %v3644_v17  ;;  %v4102_v28 = vld [vmem:[%s4668_s16 + $0x57c] sm:$0xf]  ;;  %v3847_v46 = vor.u32 %v4157_v33, %v3844_v34  ;;  %v3940_v6 = vld [vmem:[%s4668_s16 + $0x68] sm:$0xf0] }
 0x11e   : > { %2357 = vmatpush.bf16.msra.mxu1 %v3167_v22  ;;  %2297 = vmatmul.bf16.vlgmr.msra.gmra.mxu2 %v4878_v40  ;;  %v3247_v22 = vor.u32 %v4007_v13, %v3244_v14  ;;  %v3627_v44 = vor.u32 %v4102_v28, %v3624_v32  ;;  %v4087_v8 = vld [vmem:[%s4668_s16 + $0x504] sm:$0xf]  ;;  %v4142_v12 = vld [vmem:[%s4668_s16 + $0x6bc] sm:$0xf]  ;;  %v3784_v13 = vld [vmem:[%s4668_s16 + $0x6cc] sm:$0xf0] }
 0x11f   : > { %v4883_v47 = vpack.c.bf16 %v626_v38, %v626_v38  ;;  %2310 = vmatmul.bf16.vlgmr.msrb.gmra.mxu3 %v4874_v35  ;;  %v579_v54 = vpop.f32.mrf.mxu3  ;;  %2393 = vmatpush.bf16.msra.mxu2 %v3707_v42  ;;  %v3884_v38 = vld [vmem:[%s4668_s16 + $0x794] sm:$0xf0]  ;;  %v3010_v42 = vld [vmem:[%s4668_s16 + $0xa8] sm:$0xf]  ;;  %v3230_v17 = vld [vmem:[%s4668_s16 + $0x260] sm:$0xf]  ;;  %v3787_v24 = vor.u32 %v4142_v12, %v3784_v13 }
 0x120   : > { %2371 = vmatpush.bf16.msra.mxu3 %v3307_v39  ;;  %v3390_v39 = vld [vmem:[%s4668_s16 + $0x3a0] sm:$0xf]  ;;  %v3011_v52 = vor.u32 %v3950_v43, %v3010_v42  ;;  %v4005_v18 = vld [vmem:[%s4668_s16 + $0x270] sm:$0xf0]  ;;  %v4030_v20 = vld [vmem:[%s4668_s16 + $0x338] sm:$0xf0] }
 0x121   : > { %3920 = vmatmul.msk.bf16.vlgmr.msrb.gmra.mxu1 %vm2246_vm3, %v4883_v47  ;;  %2386 = vmatpush.bf16.msrb.mxu0 %v3427_v48  ;;  %v3887_v48 = vor.u32 %v4167_v37, %v3884_v38  ;;  %v3824_v54 = vld [vmem:[%s4668_s16 + $0x71c] sm:$0xf0]  ;;  %v2950_v21 = vld [vmem:[%s4668_s16 + $0x30] sm:$0xf]  ;;  %v3935_v9 = vld [vmem:[%s4668_s16 + $0x40] sm:$0xf0]  ;;  %v3231_v25 = vor.u32 %v4005_v18, %v3230_v17 }
 0x122   : > { %2358 = vmatpush.bf16.msra.mxu1 %v3147_v29  ;;  %v618_v63 = vpop.f32.mrf.mxu2  ;;  %v4045_v29 = vld [vmem:[%s4668_s16 + $0x3b0] sm:$0xf0]  ;;  %v3827_v60 = vor.u32 %v4152_v53, %v3824_v54  ;;  %v4000_v32 = vld [vmem:[%s4668_s16 + $0x248] sm:$0xf0]  ;;  %v3310_v33 = vld [vmem:[%s4668_s16 + $0x300] sm:$0xf] }
 0x123   : > { %2394 = vmatpush.bf16.msra.mxu2 %v3687_v59  ;;  %v3391_v51 = vor.u32 %v4045_v29, %v3390_v39  ;;  %v3607_v59 = vor.u32 %v4097_v49, %v3604_v50  ;;  %v4025_v34 = vld [vmem:[%s4668_s16 + $0x310] sm:$0xf0]  ;;  %v3930_v37 = vld [vmem:[%s4668_s16 + $0x18] sm:$0xf0]  ;;  %v3710_v38 = vld [vmem:[%s4668_s16 + $0x620] sm:$0xf] }
 0x124   : > { %2372 = vmatpush.bf16.msra.mxu3 %v3287_v55  ;;  %v3370_v55 = vld [vmem:[%s4668_s16 + $0x378] sm:$0xf]  ;;  %v4125_v39 = vld [vmem:[%s4668_s16 + $0x630] sm:$0xf0]  ;;  %v4132_v43 = vld [vmem:[%s4668_s16 + $0x66c] sm:$0xf] }
 0x125   : > { %2387 = vmatpush.bf16.msrb.mxu0 %v3407_v0  ;;  %v3371_v63 = vor.u32 %v4040_v56, %v3370_v55  ;;  %v3190_v49 = vld [vmem:[%s4668_s16 + $0x210] sm:$0xf]  ;;  %v3995_v50 = vld [vmem:[%s4668_s16 + $0x220] sm:$0xf0]  ;;  %v4020_v53 = vld [vmem:[%s4668_s16 + $0x2e8] sm:$0xf0] }
 0x126   : > { %2359 = vmatpush.bf16.msra.mxu1 %v3127_v58  ;;  %v3945_v58 = vld [vmem:[%s4668_s16 + $0x90] sm:$0xf0]  ;;  %v3690_v54 = vld [vmem:[%s4668_s16 + $0x5f8] sm:$0xf]  ;;  %v4120_v55 = vld [vmem:[%s4668_s16 + $0x608] sm:$0xf0] }
 0x127   : > { %2395 = vmatpush.bf16.msra.mxu2 %v3667_v11  ;;  %v2991_v0 = vor.u32 %v3945_v58, %v2990_v57  ;;  %v3564_v11 = vld [vmem:[%s4668_s16 + $0x514] sm:$0xf0]  ;;  %v3191_v57 = vor.u32 %v3995_v50, %v3190_v49  ;;  %v4127_v58 = vld [vmem:[%s4668_s16 + $0x644] sm:$0xf]  ;;  %v3170_v61 = vld [vmem:[%s4668_s16 + $0x1e8] sm:$0xf] }
 0x128   : > { %2373 = vmatpush.bf16.msra.mxu3 %v3267_v5  ;;  %2388 = vmatmul.bf16.vlgmr.msrb.gmra.mxu0 %v4878_v40  ;;  %v2970_v5 = vld [vmem:[%s4668_s16 + $0x58] sm:$0xf]  ;;  %v3990_v62 = vld [vmem:[%s4668_s16 + $0x1f8] sm:$0xf0]  ;;  %v3985_v12 = vld [vmem:[%s4668_s16 + $0x1d0] sm:$0xf0] }
 0x129   : > { %2432 = vmatpush.bf16.msra.mxu0 %v3071_v4  ;;  %v4035_v4 = vld [vmem:[%s4668_s16 + $0x360] sm:$0xf0]  ;;  %v2971_v16 = vor.u32 %v3940_v6, %v2970_v5  ;;  %v3250_v13 = vld [vmem:[%s4668_s16 + $0x288] sm:$0xf]  ;;  %v3530_v17 = vld [vmem:[%s4668_s16 + $0x4b8] sm:$0xf] }
 0x12a   : > { %2360 = vmatpush.bf16.msra.mxu1 %v3107_v10  ;;  %v3807_v10 = vor.u32 %v4147_v1, %v3804_v2  ;;  %v3351_v14 = vor.u32 %v4035_v4, %v3350_v3  ;;  %v4015_v1 = vld [vmem:[%s4668_s16 + $0x2c0] sm:$0xf0]  ;;  %v3550_v2 = vld [vmem:[%s4668_s16 + $0x4e0] sm:$0xf]  ;;  %v4085_v3 = vld [vmem:[%s4668_s16 + $0x4f0] sm:$0xf0] }
 0x12b   : > { %2396 = vmatpush.bf16.msra.mxu2 %v3647_v27  ;;  %v3764_v27 = vld [vmem:[%s4668_s16 + $0x6a4] sm:$0xf0]  ;;  %v3670_v4 = vld [vmem:[%s4668_s16 + $0x5d0] sm:$0xf]  ;;  %v4115_v5 = vld [vmem:[%s4668_s16 + $0x5e0] sm:$0xf0] }
 0x12c   : > { %2374 = vmatpush.bf16.msra.mxu3 %v3247_v22  ;;  %v3567_v22 = vor.u32 %v4087_v8, %v3564_v11  ;;  %v3150_v8 = vld [vmem:[%s4668_s16 + $0x1c0] sm:$0xf]  ;;  %v3551_v11 = vor.u32 %v4085_v3, %v3550_v2  ;;  %v4080_v18 = vld [vmem:[%s4668_s16 + $0x4c8] sm:$0xf0]  ;;  %v3490_v49 = vld [vmem:[%s4668_s16 + $0x468] sm:$0xf] }
 0x12d   : > { %2433 = vmatpush.bf16.msra.mxu0 %v3051_v19  ;;  %v3330_v19 = vld [vmem:[%s4668_s16 + $0x328] sm:$0xf]  ;;  %v4070_v50 = vld [vmem:[%s4668_s16 + $0x478] sm:$0xf0]  ;;  %v3590_v2 = vld [vmem:[%s4668_s16 + $0x530] sm:$0xf] }
 0x12e   : > { %2361 = vmatpush.bf16.msra.mxu1 %v3087_v26  ;;  %2349 = vmatmul.bf16.vlgmr.msrb.gmra.mxu2 %v4837_v41  ;;  %v4137_v26 = vld [vmem:[%s4668_s16 + $0x694] sm:$0xf]  ;;  %v3331_v28 = vor.u32 %v4030_v20, %v3330_v19  ;;  %v3910_v19 = vld [vmem:[%s4668_s16 + $0x7b0] sm:$0xf]  ;;  %v4175_v20 = vld [vmem:[%s4668_s16 + $0x7c0] sm:$0xf0] }
 0x12f   : > { %2375 = vmatmul.bf16.vlgmr.msra.gmra.mxu3 %v4841_v45  ;;  %2397 = vmatpush.bf16.msra.mxu2 %v3627_v44  ;;  %v3767_v29 = vor.u32 %v4137_v26, %v3764_v27  ;;  %v3311_v44 = vor.u32 %v4025_v34, %v3310_v33  ;;  %v3130_v26 = vld [vmem:[%s4668_s16 + $0x198] sm:$0xf]  ;;  %v3980_v27 = vld [vmem:[%s4668_s16 + $0x1a8] sm:$0xf0]  ;;  %v3890_v33 = vld [vmem:[%s4668_s16 + $0x788] sm:$0xf] }
 0x130   : > { %2425 = vmatpush.bf16.msrb.mxu3 %v3907_v31  ;;  %v3210_v31 = vld [vmem:[%s4668_s16 + $0x238] sm:$0xf]  ;;  %v4170_v34 = vld [vmem:[%s4668_s16 + $0x798] sm:$0xf0]  ;;  %v4095_v3 = vld [vmem:[%s4668_s16 + $0x540] sm:$0xf0] }
 0x131   : > { %2434 = vmatpush.bf16.msra.mxu0 %v3031_v36  ;;  %2362 = vmatmul.bf16.vlgmr.msra.gmra.mxu1 %v4826_v23  ;;  %v2930_v36 = vld [vmem:[%s4668_s16 + $0x8] sm:$0xf]  ;;  %v3211_v42 = vor.u32 %v4000_v32, %v3210_v31  ;;  %v3510_v31 = vld [vmem:[%s4668_s16 + $0x490] sm:$0xf]  ;;  %v4075_v32 = vld [vmem:[%s4668_s16 + $0x4a0] sm:$0xf0] }
 0x132   : > { %2406 = vmatpush.bf16.msrb.mxu1 %v3867_v30  ;;  %v2951_v30 = vor.u32 %v3935_v9, %v2950_v21  ;;  %v3650_v21 = vld [vmem:[%s4668_s16 + $0x5a8] sm:$0xf]  ;;  %v4110_v9 = vld [vmem:[%s4668_s16 + $0x5b8] sm:$0xf0] }
 0x133   : > { %2398 = vmatpush.bf16.msra.mxu2 %v3607_v59  ;;  %v3724_v59 = vld [vmem:[%s4668_s16 + $0x654] sm:$0xf0] }
 0x134   : > { %2426 = vmatpush.bf16.msrb.mxu3 %v3887_v48  ;;  %v3744_v48 = vld [vmem:[%s4668_s16 + $0x67c] sm:$0xf0]  ;;  %v3727_v6 = vor.u32 %v4127_v58, %v3724_v59  ;;  %v3090_v58 = vld [vmem:[%s4668_s16 + $0x148] sm:$0xf]  ;;  %v3970_v59 = vld [vmem:[%s4668_s16 + $0x158] sm:$0xf0] }
 0x135   : > { %2435 = vmatpush.bf16.msra.mxu0 %v3011_v52  ;;  %v3290_v52 = vld [vmem:[%s4668_s16 + $0x2d8] sm:$0xf]  ;;  %v3747_v56 = vor.u32 %v4132_v43, %v3744_v48  ;;  %v3110_v43 = vld [vmem:[%s4668_s16 + $0x170] sm:$0xf] }
 0x136   : > { %2407 = vmatpush.bf16.msrb.mxu1 %v3847_v46  ;;  %v2931_v46 = vor.u32 %v3930_v37, %v2930_v36  ;;  %v3630_v36 = vld [vmem:[%s4668_s16 + $0x580] sm:$0xf]  ;;  %v4105_v37 = vld [vmem:[%s4668_s16 + $0x590] sm:$0xf0] }
 0x137   : > { %2399 = vmatpush.bf16.msra.mxu2 %v3587_v7  ;;  %v3171_v7 = vor.u32 %v3990_v62, %v3170_v61  ;;  %v3631_v48 = vor.u32 %v4105_v37, %v3630_v36  ;;  %v4065_v62 = vld [vmem:[%s4668_s16 + $0x450] sm:$0xf0]  ;;  %v4038_v36 = vld [vmem:[%s4668_s16 + $0x37c] sm:$0xf]  ;;  %v3372_v37 = vld [vmem:[%s4668_s16 + $0x38c] sm:$0xf0] }
 0x138   : > { %2458 = vmatpush.bf16.msra.mxu3 %v3391_v51  ;;  %v3711_v51 = vor.u32 %v4125_v39, %v3710_v38  ;;  %v3131_v38 = vor.u32 %v3980_v27, %v3130_v26  ;;  %v4003_v39 = vld [vmem:[%s4668_s16 + $0x264] sm:$0xf] }
 0x139   : > { %2436 = vmatpush.bf16.msra.mxu0 %v2991_v0  ;;  %v3691_v0 = vor.u32 %v4120_v55, %v3690_v54  ;;  %v3998_v55 = vld [vmem:[%s4668_s16 + $0x23c] sm:$0xf]  ;;  %v4055_v27 = vld [vmem:[%s4668_s16 + $0x400] sm:$0xf0] }
 0x13a   : > { %2408 = vmatpush.bf16.msrb.mxu1 %v3827_v60  ;;  %v3291_v60 = vor.u32 %v4020_v53, %v3290_v52  ;;  %v3610_v52 = vld [vmem:[%s4668_s16 + $0x558] sm:$0xf]  ;;  %v4100_v53 = vld [vmem:[%s4668_s16 + $0x568] sm:$0xf0] }
 0x13b   : > { %2400 = vmatpush.bf16.msra.mxu2 %v3567_v22  ;;  %v3151_v22 = vor.u32 %v3985_v12, %v3150_v8  ;;  %v3611_v61 = vor.u32 %v4100_v53, %v3610_v52  ;;  %v4060_v12 = vld [vmem:[%s4668_s16 + $0x428] sm:$0xf0]  ;;  %v3132_v52 = vld [vmem:[%s4668_s16 + $0x1ac] sm:$0xf0]  ;;  %v4033_v53 = vld [vmem:[%s4668_s16 + $0x354] sm:$0xf] }
 0x13c   : > { %2459 = vmatpush.bf16.msra.mxu3 %v3371_v63  ;;  %v3270_v63 = vld [vmem:[%s4668_s16 + $0x2b0] sm:$0xf] }
 0x13d   : > { %2437 = vmatpush.bf16.msra.mxu0 %v2971_v16  ;;  %v3671_v16 = vor.u32 %v4115_v5, %v3670_v4  ;;  %v3091_v4 = vor.u32 %v3970_v59, %v3090_v58  ;;  %v3993_v5 = vld [vmem:[%s4668_s16 + $0x214] sm:$0xf]  ;;  %v3790_v58 = vld [vmem:[%s4668_s16 + $0x6c0] sm:$0xf] }
 0x13e   : > { %2409 = vmatpush.bf16.msrb.mxu1 %v3807_v10  ;;  %2401 = vmatmul.bf16.vlgmr.msra.gmra.mxu2 %v4874_v35  ;;  %v3271_v10 = vor.u32 %v4015_v1, %v3270_v63  ;;  %v3870_v63 = vld [vmem:[%s4668_s16 + $0x760] sm:$0xf]  ;;  %v4145_v59 = vld [vmem:[%s4668_s16 + $0x6d0] sm:$0xf0] }
 0x13f   : > { %2445 = vmatpush.bf16.msrb.mxu2 %v3231_v25  ;;  %3921 = vmatmul.msk.bf16.vlgmr.msrb.gmra.mxu3 %vm2246_vm3, %v4883_v47  ;;  %v3531_v25 = vor.u32 %v4080_v18, %v3530_v17  ;;  %v3570_v17 = vld [vmem:[%s4668_s16 + $0x508] sm:$0xf]  ;;  %v4090_v18 = vld [vmem:[%s4668_s16 + $0x518] sm:$0xf0] }
 0x140   : > { %2460 = vmatpush.bf16.msra.mxu3 %v3351_v14  ;;  %v4010_v14 = vld [vmem:[%s4668_s16 + $0x298] sm:$0xf0]  ;;  %v3571_v26 = vor.u32 %v4090_v18, %v3570_v17  ;;  %v3312_v17 = vld [vmem:[%s4668_s16 + $0x314] sm:$0xf0] }
 0x141   : > { %2438 = vmatpush.bf16.msra.mxu0 %v2951_v30  ;;  %v3651_v30 = vor.u32 %v4110_v9, %v3650_v21  ;;  %v4043_v21 = vld [vmem:[%s4668_s16 + $0x3a4] sm:$0xf]  ;;  %v3392_v9 = vld [vmem:[%s4668_s16 + $0x3b4] sm:$0xf0] }
 0x142   : > { %2410 = vmatpush.bf16.msrb.mxu1 %v3787_v24  ;;  %v3251_v24 = vor.u32 %v4010_v14, %v3250_v13  ;;  %v3850_v13 = vld [vmem:[%s4668_s16 + $0x738] sm:$0xf]  ;;  %v4160_v14 = vld [vmem:[%s4668_s16 + $0x748] sm:$0xf0] }
 0x143   : > { %2446 = vmatpush.bf16.msrb.mxu2 %v3211_v42  ;;  %v3511_v42 = vor.u32 %v4075_v32, %v3510_v31  ;;  %v3395_v32 = vor.u32 %v4043_v21, %v3392_v9  ;;  %v3750_v9 = vld [vmem:[%s4668_s16 + $0x670] sm:$0xf] }
 0x144   : > { %2461 = vmatpush.bf16.msra.mxu3 %v3331_v28  ;;  %v3911_v28 = vor.u32 %v4175_v20, %v3910_v19  ;;  %v3988_v19 = vld [vmem:[%s4668_s16 + $0x1ec] sm:$0xf]  ;;  %v3172_v20 = vld [vmem:[%s4668_s16 + $0x1fc] sm:$0xf0] }
 0x145   : > { %2439 = vmatpush.bf16.msra.mxu0 %v2931_v46  ;;  %v3891_v46 = vor.u32 %v4170_v34, %v3890_v33  ;;  %v3175_v31 = vor.u32 %v3988_v19, %v3172_v20  ;;  %v3983_v33 = vld [vmem:[%s4668_s16 + $0x1c4] sm:$0xf]  ;;  %v3152_v34 = vld [vmem:[%s4668_s16 + $0x1d4] sm:$0xf0] }
 0x146   : > { %2411 = vmatpush.bf16.msrb.mxu1 %v3767_v29  ;;  %v3232_v29 = vld [vmem:[%s4668_s16 + $0x274] sm:$0xf0]  ;;  %v4163_v19 = vld [vmem:[%s4668_s16 + $0x764] sm:$0xf] }
 0x147   : > { %2447 = vmatpush.bf16.msrb.mxu2 %v3191_v57  ;;  %v3491_v57 = vor.u32 %v4070_v50, %v3490_v49  ;;  %v3963_v49 = vld [vmem:[%s4668_s16 + $0x124] sm:$0xf]  ;;  %v3072_v50 = vld [vmem:[%s4668_s16 + $0x134] sm:$0xf0] }
 0x148   : > { %2462 = vmatpush.bf16.msra.mxu3 %v3311_v44  ;;  %2440 = vmatmul.bf16.vlgmr.msra.gmra.mxu0 %v4837_v41  ;;  %v3975_v44 = vld [vmem:[%s4668_s16 + $0x180] sm:$0xf0]  ;;  %v3872_v20 = vld [vmem:[%s4668_s16 + $0x774] sm:$0xf0] }
 0x149   : > { %2484 = vmatpush.bf16.msrb.mxu0 %v3711_v51  ;;  %v3235_v51 = vor.u32 %v4003_v39, %v3232_v29  ;;  %v3111_v54 = vor.u32 %v3975_v44, %v3110_v43  ;;  %v3410_v29 = vld [vmem:[%s4668_s16 + $0x3c8] sm:$0xf]  ;;  %v4150_v44 = vld [vmem:[%s4668_s16 + $0x6f8] sm:$0xf0] }
 0x14a   : > { %2412 = vmatpush.bf16.msrb.mxu1 %v3747_v56  ;;  %v3212_v56 = vld [vmem:[%s4668_s16 + $0x24c] sm:$0xf0]  ;;  %v3810_v43 = vld [vmem:[%s4668_s16 + $0x6e8] sm:$0xf] }
 0x14b   : > { %2448 = vmatpush.bf16.msrb.mxu2 %v3171_v7  ;;  %v3215_v1 = vor.u32 %v3998_v55, %v3212_v56  ;;  %v3811_v56 = vor.u32 %v4150_v44, %v3810_v43  ;;  %v4083_v43 = vld [vmem:[%s4668_s16 + $0x4e4] sm:$0xf]  ;;  %v3552_v44 = vld [vmem:[%s4668_s16 + $0x4f4] sm:$0xf0] }
 0x14c   : > { %2463 = vmatpush.bf16.msra.mxu3 %v3291_v60  ;;  %v3470_v60 = vld [vmem:[%s4668_s16 + $0x440] sm:$0xf] }
 0x14d   : > { %2485 = vmatpush.bf16.msrb.mxu0 %v3691_v0  ;;  %v4165_v0 = vld [vmem:[%s4668_s16 + $0x770] sm:$0xf0]  ;;  %v3471_v7 = vor.u32 %v4065_v62, %v3470_v60  ;;  %v3958_v62 = vld [vmem:[%s4668_s16 + $0xfc] sm:$0xf] }
 0x14e   : > { %2413 = vmatpush.bf16.msrb.mxu1 %v3727_v6  ;;  %v3192_v6 = vld [vmem:[%s4668_s16 + $0x224] sm:$0xf0]  ;;  %v3871_v8 = vor.u32 %v4165_v0, %v3870_v63  ;;  %v3052_v63 = vld [vmem:[%s4668_s16 + $0x10c] sm:$0xf0]  ;;  %v3973_v0 = vld [vmem:[%s4668_s16 + $0x174] sm:$0xf] }
 0x14f   : > { %2449 = vmatpush.bf16.msrb.mxu2 %v3151_v22 }
 0x150   : > { %2464 = vmatpush.bf16.msra.mxu3 %v3271_v10  ;;  %v3450_v10 = vld [vmem:[%s4668_s16 + $0x418] sm:$0xf] }
 0x151   : > { %2486 = vmatpush.bf16.msrb.mxu0 %v3671_v16  ;;  %2414 = vmatmul.bf16.vlgmr.msrb.gmra.mxu1 %v4863_v15  ;;  %v3195_v16 = vor.u32 %v3993_v5, %v3192_v6  ;;  %v3451_v22 = vor.u32 %v4060_v12, %v3450_v10  ;;  %v3055_v5 = vor.u32 %v3958_v62, %v3052_v63  ;;  %v3770_v6 = vld [vmem:[%s4668_s16 + $0x698] sm:$0xf]  ;;  %v3032_v12 = vld [vmem:[%s4668_s16 + $0xe4] sm:$0xf0]  ;;  %v3252_v62 = vld [vmem:[%s4668_s16 + $0x29c] sm:$0xf0] }
 0x152   : > { %2471 = vmatpush.bf16.msra.mxu1 %v3551_v11  ;;  %v3591_v11 = vor.u32 %v4095_v3, %v3590_v2  ;;  %v4028_v2 = vld [vmem:[%s4668_s16 + $0x32c] sm:$0xf]  ;;  %v3332_v3 = vld [vmem:[%s4668_s16 + $0x33c] sm:$0xf0] }
 0x153   : > { %2450 = vmatpush.bf16.msrb.mxu2 %v3131_v38  ;;  %v3335_v10 = vor.u32 %v4028_v2, %v3332_v3  ;;  %v4148_v63 = vld [vmem:[%s4668_s16 + $0x6ec] sm:$0xf]  ;;  %v3912_v2 = vld [vmem:[%s4668_s16 + $0x7c4] sm:$0xf0] }
 0x154   : > { %2465 = vmatpush.bf16.msra.mxu3 %v3251_v24  ;;  %v3851_v24 = vor.u32 %v4160_v14, %v3850_v13  ;;  %v3968_v13 = vld [vmem:[%s4668_s16 + $0x14c] sm:$0xf]  ;;  %v3092_v14 = vld [vmem:[%s4668_s16 + $0x15c] sm:$0xf0] }
 0x155   : > { %2487 = vmatpush.bf16.msrb.mxu0 %v3651_v30  ;;  %v4155_v30 = vld [vmem:[%s4668_s16 + $0x720] sm:$0xf0] }
 0x156   : > { %2472 = vmatpush.bf16.msra.mxu1 %v3531_v25  ;;  %v3430_v25 = vld [vmem:[%s4668_s16 + $0x3f0] sm:$0xf] }
 0x157   : > { %2466 = vmatmul.bf16.vlgmr.msra.gmra.mxu3 %v4841_v45  ;;  %2451 = vmatpush.bf16.msrb.mxu2 %v3111_v54  ;;  %v3431_v38 = vor.u32 %v4055_v27, %v3430_v25  ;;  %v3352_v54 = vld [vmem:[%s4668_s16 + $0x364] sm:$0xf0]  ;;  %v3012_v27 = vld [vmem:[%s4668_s16 + $0xbc] sm:$0xf0] }
 0x158   : > { %2516 = vmatpush.bf16.msrb.mxu3 %v3911_v28  ;;  %v3830_v28 = vld [vmem:[%s4668_s16 + $0x710] sm:$0xf] }
 0x159   : > { %2488 = vmatpush.bf16.msrb.mxu0 %v3631_v48  ;;  %v3831_v39 = vor.u32 %v4155_v30, %v3830_v28  ;;  %v3375_v48 = vor.u32 %v4038_v36, %v3372_v37  ;;  %v3875_v28 = vor.u32 %v4163_v19, %v3872_v20  ;;  %v4018_v30 = vld [vmem:[%s4668_s16 + $0x2dc] sm:$0xf]  ;;  %v3730_v37 = vld [vmem:[%s4668_s16 + $0x648] sm:$0xf]  ;;  %v3928_v20 = vld [vmem:[%s4668_s16 + $0xc] sm:$0xf] }
 0x15a   : > { %2473 = vmatpush.bf16.msra.mxu1 %v3511_v42  ;;  %v4050_v42 = vld [vmem:[%s4668_s16 + $0x3d8] sm:$0xf0] }
 0x15b   : > { %2452 = vmatpush.bf16.msrb.mxu2 %v3091_v4  ;;  %v3411_v55 = vor.u32 %v4050_v42, %v3410_v29  ;;  %v3791_v4 = vor.u32 %v4145_v59, %v3790_v58  ;;  %v2992_v42 = vld [vmem:[%s4668_s16 + $0x94] sm:$0xf0]  ;;  %v4078_v58 = vld [vmem:[%s4668_s16 + $0x4bc] sm:$0xf]  ;;  %v3532_v59 = vld [vmem:[%s4668_s16 + $0x4cc] sm:$0xf0] }
 0x15c   : > { %2517 = vmatpush.bf16.msrb.mxu3 %v3891_v46  ;;  %v3155_v46 = vor.u32 %v3983_v33, %v3152_v34  ;;  %v4158_v33 = vld [vmem:[%s4668_s16 + $0x73c] sm:$0xf]  ;;  %v3852_v34 = vld [vmem:[%s4668_s16 + $0x74c] sm:$0xf0] }
 0x15d   : > { %2489 = vmatpush.bf16.msrb.mxu0 %v3611_v61  ;;  %v3355_v61 = vor.u32 %v4033_v53, %v3352_v54  ;;  %v3555_v54 = vor.u32 %v4083_v43, %v3552_v44  ;;  %v4118_v44 = vld [vmem:[%s4668_s16 + $0x5fc] sm:$0xf] }
 0x15e   : > { %2474 = vmatpush.bf16.msra.mxu1 %v3491_v57  ;;  %2453 = vmatmul.bf16.vlgmr.msrb.gmra.mxu2 %v4826_v23  ;;  %v3075_v57 = vor.u32 %v3963_v49, %v3072_v50  ;;  %v3272_v49 = vld [vmem:[%s4668_s16 + $0x2c4] sm:$0xf0] }
 0x15f   : > { %2497 = vmatpush.bf16.msra.mxu2 %v3871_v8 }
 0x160   : > { %2536 = vmatpush.bf16.msra.mxu3 %v3235_v51  ;;  %v3978_v51 = vld [vmem:[%s4668_s16 + $0x19c] sm:$0xf] }
 0x161   : > { %2490 = vmatpush.bf16.msrb.mxu0 %v3591_v11  ;;  %v3135_v60 = vor.u32 %v3978_v51, %v3132_v52  ;;  %v3953_v11 = vld [vmem:[%s4668_s16 + $0xd4] sm:$0xf]  ;;  %v3832_v52 = vld [vmem:[%s4668_s16 + $0x724] sm:$0xf0] }
 0x162   : > { %2475 = vmatpush.bf16.msra.mxu1 %v3471_v7  ;;  %v4140_v7 = vld [vmem:[%s4668_s16 + $0x6a8] sm:$0xf0]  ;;  %v3035_v21 = vor.u32 %v3953_v11, %v3032_v12  ;;  %v4153_v51 = vld [vmem:[%s4668_s16 + $0x714] sm:$0xf] }
 0x163   : > { %2498 = vmatpush.bf16.msra.mxu2 %v3851_v24  ;;  %v3771_v18 = vor.u32 %v4140_v7, %v3770_v6  ;;  %v3095_v24 = vor.u32 %v3968_v13, %v3092_v14  ;;  %v2952_v7 = vld [vmem:[%s4668_s16 + $0x44] sm:$0xf0]  ;;  %v4143_v13 = vld [vmem:[%s4668_s16 + $0x6c4] sm:$0xf]  ;;  %v3792_v14 = vld [vmem:[%s4668_s16 + $0x6d4] sm:$0xf0] }
 0x164   : > { %2537 = vmatpush.bf16.msra.mxu3 %v3215_v1  ;;  %v3112_v1 = vld [vmem:[%s4668_s16 + $0x184] sm:$0xf0] }
 0x165   : > { %2491 = vmatpush.bf16.msrb.mxu0 %v3571_v26  ;;  %v3115_v8 = vor.u32 %v3973_v0, %v3112_v1  ;;  %v3948_v26 = vld [vmem:[%s4668_s16 + $0xac] sm:$0xf]  ;;  %v3812_v0 = vld [vmem:[%s4668_s16 + $0x6fc] sm:$0xf0]  ;;  %v4173_v1 = vld [vmem:[%s4668_s16 + $0x7b4] sm:$0xf] }
 0x166   : > { %2476 = vmatpush.bf16.msra.mxu1 %v3451_v22  ;;  %v4135_v22 = vld [vmem:[%s4668_s16 + $0x680] sm:$0xf0]  ;;  %v3015_v36 = vor.u32 %v3948_v26, %v3012_v27  ;;  %v3815_v11 = vor.u32 %v4148_v63, %v3812_v0  ;;  %v3915_v12 = vor.u32 %v4173_v1, %v3912_v2  ;;  %v3795_v26 = vor.u32 %v4143_v13, %v3792_v14  ;;  %v3732_v63 = vld [vmem:[%s4668_s16 + $0x65c] sm:$0xf0]  ;;  %v3558_v0 = vld [vmem:[%s4668_s16 + $0x4e8] sm:$0xf] }
 0x167   : > { %3922 = vmatmul.msk.bf16.vlgmr.msrb.gmra.mxu3 %vm2246_vm3, %v4883_v47  ;;  %2499 = vmatpush.bf16.msra.mxu2 %v3831_v39  ;;  %v3943_v39 = vld [vmem:[%s4668_s16 + $0x84] sm:$0xf]  ;;  %v4086_v2 = vld [vmem:[%s4668_s16 + $0x4f8] sm:$0xf0]  ;;  %v3538_v14 = vld [vmem:[%s4668_s16 + $0x4c0] sm:$0xf] }
 0x168   : > { %2538 = vmatpush.bf16.msra.mxu3 %v3195_v16  ;;  %2492 = vmatmul.bf16.vlgmr.msrb.gmra.mxu0 %v4874_v35  ;;  %v4023_v16 = vld [vmem:[%s4668_s16 + $0x304] sm:$0xf]  ;;  %v2995_v53 = vor.u32 %v3943_v39, %v2992_v42  ;;  %v3472_v42 = vld [vmem:[%s4668_s16 + $0x454] sm:$0xf0] }
 0x169   : > { %2549 = vmatpush.bf16.msra.mxu0 %v3395_v32  ;;  %v3315_v25 = vor.u32 %v4023_v16, %v3312_v17  ;;  %v3751_v32 = vor.u32 %v4135_v22, %v3750_v9  ;;  %v4168_v16 = vld [vmem:[%s4668_s16 + $0x78c] sm:$0xf]  ;;  %v3892_v17 = vld [vmem:[%s4668_s16 + $0x79c] sm:$0xf0]  ;;  %v4006_v9 = vld [vmem:[%s4668_s16 + $0x278] sm:$0xf0] }
 0x16a   : > { %2477 = vmatpush.bf16.msra.mxu1 %v3431_v38  ;;  %v4130_v38 = vld [vmem:[%s4668_s16 + $0x658] sm:$0xf0]  ;;  %v2932_v22 = vld [vmem:[%s4668_s16 + $0x1c] sm:$0xf0]  ;;  %v3895_v27 = vor.u32 %v4168_v16, %v3892_v17  ;;  %v4081_v16 = vld [vmem:[%s4668_s16 + $0x4d0] sm:$0xf0] }
 0x16b   : > { %2500 = vmatpush.bf16.msra.mxu2 %v3811_v56  ;;  %v3731_v50 = vor.u32 %v4130_v38, %v3730_v37  ;;  %v3218_v37 = vld [vmem:[%s4668_s16 + $0x240] sm:$0xf]  ;;  %v4001_v38 = vld [vmem:[%s4668_s16 + $0x250] sm:$0xf0] }
 0x16c   : > { %2539 = vmatpush.bf16.msra.mxu3 %v3175_v31  ;;  %v3292_v31 = vld [vmem:[%s4668_s16 + $0x2ec] sm:$0xf0] }
 0x16d   : > { %2550 = vmatpush.bf16.msra.mxu0 %v3375_v48  ;;  %v3295_v29 = vor.u32 %v4018_v30, %v3292_v31  ;;  %v4013_v48 = vld [vmem:[%s4668_s16 + $0x2b4] sm:$0xf]  ;;  %v3712_v30 = vld [vmem:[%s4668_s16 + $0x634] sm:$0xf0] }
 0x16e   : > { %2478 = vmatpush.bf16.msra.mxu1 %v3411_v55  ;;  %v3938_v55 = vld [vmem:[%s4668_s16 + $0x5c] sm:$0xf]  ;;  %v3275_v56 = vor.u32 %v4013_v48, %v3272_v49  ;;  %v3219_v48 = vor.u32 %v4001_v38, %v3218_v37  ;;  %v4133_v49 = vld [vmem:[%s4668_s16 + $0x674] sm:$0xf]  ;;  %v4076_v37 = vld [vmem:[%s4668_s16 + $0x4a8] sm:$0xf0] }
 0x16f   : > { %2501 = vmatpush.bf16.msra.mxu2 %v3791_v4  ;;  %v3535_v4 = vor.u32 %v4078_v58, %v3532_v59  ;;  %v4113_v59 = vld [vmem:[%s4668_s16 + $0x5d4] sm:$0xf] }
 0x170   : > { %2540 = vmatpush.bf16.msra.mxu3 %v3155_v46  ;;  %v3855_v46 = vor.u32 %v4158_v33, %v3852_v34  ;;  %v3772_v33 = vld [vmem:[%s4668_s16 + $0x6ac] sm:$0xf0]  ;;  %v2935_v34 = vor.u32 %v3928_v20, %v2932_v22  ;;  %v3986_v20 = vld [vmem:[%s4668_s16 + $0x1d8] sm:$0xf0]  ;;  %v4048_v22 = vld [vmem:[%s4668_s16 + $0x3cc] sm:$0xf] }
 0x171   : > { %2551 = vmatpush.bf16.msra.mxu0 %v3355_v61  ;;  %2479 = vmatmul.bf16.vlgmr.msra.gmra.mxu1 %v4878_v40  ;;  %v4008_v61 = vld [vmem:[%s4668_s16 + $0x28c] sm:$0xf] }
 0x172   : > { %2523 = vmatpush.bf16.msrb.mxu1 %v3075_v57  ;;  %v2972_v57 = vld [vmem:[%s4668_s16 + $0x6c] sm:$0xf0]  ;;  %v3255_v6 = vor.u32 %v4008_v61, %v3252_v62  ;;  %v4128_v62 = vld [vmem:[%s4668_s16 + $0x64c] sm:$0xf] }
 0x173   : > { %2502 = vmatpush.bf16.msra.mxu2 %v3771_v18  ;;  %v2975_v3 = vor.u32 %v3938_v55, %v2972_v57  ;;  %v4058_v55 = vld [vmem:[%s4668_s16 + $0x41c] sm:$0xf] }
 0x174   : > { %2541 = vmatpush.bf16.msra.mxu3 %v3135_v60  ;;  %v3835_v60 = vor.u32 %v4153_v51, %v3832_v52  ;;  %v3198_v52 = vld [vmem:[%s4668_s16 + $0x218] sm:$0xf] }
 0x175   : > { %2552 = vmatpush.bf16.msra.mxu0 %v3335_v10  ;;  %v3512_v10 = vld [vmem:[%s4668_s16 + $0x4a4] sm:$0xf0] }
 0x176   : > { %2524 = vmatpush.bf16.msrb.mxu1 %v3055_v5  ;;  %v3933_v5 = vld [vmem:[%s4668_s16 + $0x34] sm:$0xf] }
 0x177   : > { %2503 = vmatpush.bf16.msra.mxu2 %v3751_v32  ;;  %v2955_v18 = vor.u32 %v3933_v5, %v2952_v7  ;;  %v4138_v32 = vld [vmem:[%s4668_s16 + $0x69c] sm:$0xf]  ;;  %v3432_v7 = vld [vmem:[%s4668_s16 + $0x404] sm:$0xf0] }
 0x178   : > { %2542 = vmatpush.bf16.msra.mxu3 %v3115_v8  ;;  %v4073_v8 = vld [vmem:[%s4668_s16 + $0x494] sm:$0xf]  ;;  %v3775_v43 = vor.u32 %v4138_v32, %v3772_v33 }
 0x179   : > { %2553 = vmatpush.bf16.msra.mxu0 %v3315_v25  ;;  %v3515_v19 = vor.u32 %v4073_v8, %v3512_v10  ;;  %v3492_v25 = vld [vmem:[%s4668_s16 + $0x47c] sm:$0xf0]  ;;  %v3735_v8 = vor.u32 %v4128_v62, %v3732_v63  ;;  %v4108_v10 = vld [vmem:[%s4668_s16 + $0x5ac] sm:$0xf]  ;;  %v4093_v62 = vld [vmem:[%s4668_s16 + $0x534] sm:$0xf] }
 0x17a   : > { %2525 = vmatpush.bf16.msrb.mxu1 %v3035_v21  ;;  %v3238_v21 = vld [vmem:[%s4668_s16 + $0x268] sm:$0xf] }
 0x17b   : > { %2504 = vmatpush.bf16.msra.mxu2 %v3731_v50  ;;  %v3239_v31 = vor.u32 %v4006_v9, %v3238_v21  ;;  %v3752_v50 = vld [vmem:[%s4668_s16 + $0x684] sm:$0xf0] }
 0x17c   : > { %2543 = vmatpush.bf16.msra.mxu3 %v3095_v24  ;;  %v4068_v24 = vld [vmem:[%s4668_s16 + $0x46c] sm:$0xf]  ;;  %v3755_v58 = vor.u32 %v4133_v49, %v3752_v50  ;;  %v3961_v49 = vld [vmem:[%s4668_s16 + $0x110] sm:$0xf0] }
 0x17d   : > { %2554 = vmatpush.bf16.msra.mxu0 %v3295_v29  ;;  %v4063_v29 = vld [vmem:[%s4668_s16 + $0x444] sm:$0xf] }
 0x17e   : > { %2526 = vmatpush.bf16.msrb.mxu1 %v3015_v36  ;;  %2505 = vmatmul.bf16.vlgmr.msra.gmra.mxu2 %v4863_v15  ;;  %v3495_v36 = vor.u32 %v4068_v24, %v3492_v25  ;;  %v3475_v51 = vor.u32 %v4063_v29, %v3472_v42  ;;  %v3412_v24 = vld [vmem:[%s4668_s16 + $0x3dc] sm:$0xf0]  ;;  %v4103_v25 = vld [vmem:[%s4668_s16 + $0x584] sm:$0xf]  ;;  %v3981_v42 = vld [vmem:[%s4668_s16 + $0x1b0] sm:$0xf0] }
 0x17f   : > { %2544 = vmatmul.bf16.vlgmr.msra.gmra.mxu3 %v4826_v23  ;;  %2562 = vmatpush.bf16.msrb.mxu2 %v3555_v54  ;;  %v3138_v29 = vld [vmem:[%s4668_s16 + $0x1a0] sm:$0xf] }
 0x180   : > { %2588 = vmatpush.bf16.msrb.mxu3 %v3875_v28  ;;  %v4123_v28 = vld [vmem:[%s4668_s16 + $0x624] sm:$0xf] }
 0x181   : > { %2555 = vmatpush.bf16.msra.mxu0 %v3275_v56  ;;  %v3715_v39 = vor.u32 %v4123_v28, %v3712_v30  ;;  %v3452_v56 = vld [vmem:[%s4668_s16 + $0x42c] sm:$0xf0]  ;;  %v3078_v28 = vld [vmem:[%s4668_s16 + $0x128] sm:$0xf]  ;;  %v3966_v30 = vld [vmem:[%s4668_s16 + $0x138] sm:$0xf0] }
 0x182   : > { %2527 = vmatpush.bf16.msrb.mxu1 %v2995_v53  ;;  %v3996_v53 = vld [vmem:[%s4668_s16 + $0x228] sm:$0xf0]  ;;  %v3455_v1 = vor.u32 %v4058_v55, %v3452_v56 }
 0x183   : > { %2563 = vmatpush.bf16.msrb.mxu2 %v3535_v4  ;;  %v3199_v61 = vor.u32 %v3996_v53, %v3198_v52  ;;  %v3991_v4 = vld [vmem:[%s4668_s16 + $0x200] sm:$0xf0]  ;;  %v3139_v52 = vor.u32 %v3981_v42, %v3138_v29  ;;  %v3498_v53 = vld [vmem:[%s4668_s16 + $0x470] sm:$0xf]  ;;  %v3378_v29 = vld [vmem:[%s4668_s16 + $0x380] sm:$0xf] }
 0x184   : > { %2589 = vmatpush.bf16.msrb.mxu3 %v3855_v46  ;;  %v3692_v46 = vld [vmem:[%s4668_s16 + $0x60c] sm:$0xf0]  ;;  %v4041_v42 = vld [vmem:[%s4668_s16 + $0x390] sm:$0xf0] }
 0x185   : > { %2556 = vmatpush.bf16.msra.mxu0 %v3255_v6  ;;  %v3695_v54 = vor.u32 %v4118_v44, %v3692_v46  ;;  %v5140_v57 = vpop.f32.mrf.mxu0  ;;  %v4053_v6 = vld [vmem:[%s4668_s16 + $0x3f4] sm:$0xf]  ;;  %v3612_v46 = vld [vmem:[%s4668_s16 + $0x56c] sm:$0xf0] }
 0x186   : > { %2528 = vmatpush.bf16.msrb.mxu1 %v2975_v3  ;;  %v3178_v3 = vld [vmem:[%s4668_s16 + $0x1f0] sm:$0xf]  ;;  %v3435_v17 = vor.u32 %v4053_v6, %v3432_v7  ;;  %v4066_v6 = vld [vmem:[%s4668_s16 + $0x458] sm:$0xf0] }
 0x187   : > { %2564 = vmatpush.bf16.msrb.mxu2 %v3515_v19  ;;  %v3179_v13 = vor.u32 %v3991_v4, %v3178_v3  ;;  %v3158_v19 = vld [vmem:[%s4668_s16 + $0x1c8] sm:$0xf]  ;;  %v3098_v7 = vld [vmem:[%s4668_s16 + $0x150] sm:$0xf] }
 0x188   : > { %2590 = vmatpush.bf16.msrb.mxu3 %v3835_v60  ;;  %2557 = vmatmul.bf16.vlgmr.msra.gmra.mxu0 %v4841_v45  ;;  %v3672_v60 = vld [vmem:[%s4668_s16 + $0x5e4] sm:$0xf0]  ;;  %v3159_v33 = vor.u32 %v3986_v20, %v3158_v19 }
 0x189   : > { %2607 = vmatpush.bf16.msrb.mxu0 %v3915_v12  ;;  %v3675_v5 = vor.u32 %v4113_v59, %v3672_v60  ;;  %v3559_v12 = vor.u32 %v4086_v2, %v3558_v0  ;;  %v3118_v60 = vld [vmem:[%s4668_s16 + $0x178] sm:$0xf]  ;;  %v3592_v0 = vld [vmem:[%s4668_s16 + $0x544] sm:$0xf0]  ;;  %v3956_v2 = vld [vmem:[%s4668_s16 + $0xe8] sm:$0xf0] }
 0x18a   : > { %2529 = vmatpush.bf16.msrb.mxu1 %v2955_v18  ;;  %v5158_v18 = vld [vmem:[%s4672_s4] sm:$0x1f]  ;;  %v3878_v19 = vld [vmem:[%s4668_s16 + $0x768] sm:$0xf] }
 0x18b   : > { %2565 = vmatpush.bf16.msrb.mxu2 %v3495_v36  ;;  %v936_v32 = vperm.slane %v5158_v18, 0  ;;  %v3518_v36 = vld [vmem:[%s4668_s16 + $0x498] sm:$0xf] }
 0x18c   : > { %2591 = vmatpush.bf16.msrb.mxu3 %v3815_v11  ;;  %v3652_v11 = vld [vmem:[%s4668_s16 + $0x5bc] sm:$0xf0] }
 0x18d   : > { %2608 = vmatpush.bf16.msrb.mxu0 %v3895_v27  ;;  %v3655_v9 = vor.u32 %v4108_v10, %v3652_v11  ;;  %v3632_v27 = vld [vmem:[%s4668_s16 + $0x594] sm:$0xf0]  ;;  %v3971_v11 = vld [vmem:[%s4668_s16 + $0x160] sm:$0xf0] }
 0x18e   : > { %2530 = vmatpush.bf16.msrb.mxu1 %v2935_v34  ;;  %v2285_v21 = vpop.f32.mrf.mxu1  ;;  %v3415_v34 = vor.u32 %v4048_v22, %v3412_v24  ;;  %v3635_v38 = vor.u32 %v4103_v25, %v3632_v27  ;;  %v4046_v22 = vld [vmem:[%s4668_s16 + $0x3b8] sm:$0xf0]  ;;  %v3099_v24 = vor.u32 %v3971_v11, %v3098_v7  ;;  %v3458_v25 = vld [vmem:[%s4668_s16 + $0x420] sm:$0xf]  ;;  %v3338_v11 = vld [vmem:[%s4668_s16 + $0x330] sm:$0xf] }
 0x18f   : > { %2566 = vmatpush.bf16.msrb.mxu2 %v3475_v51  ;;  %v3519_v51 = vor.u32 %v4076_v37, %v3518_v36  ;;  %v3946_v36 = vld [vmem:[%s4668_s16 + $0x98] sm:$0xf0]  ;;  %v3858_v37 = vld [vmem:[%s4668_s16 + $0x740] sm:$0xf] }
 0x190   : > { %2592 = vmatpush.bf16.msrb.mxu3 %v3795_v26  ;;  %v2274_v26 = vpop.f32.mrf.mxu0 }
 0x191   : > { %2627 = vmatpush.bf16.msra.mxu0 %v3239_v31  ;;  %2531 = vmatmul.bf16.vlgmr.msrb.gmra.mxu1 %v4837_v41  ;;  %v3539_v31 = vor.u32 %v4081_v16, %v3538_v14  ;;  %v2259_v44 = vpop.f32.mrf.mxu3  ;;  %v3018_v16 = vld [vmem:[%s4668_s16 + $0xb0] sm:$0xf]  ;;  %v4061_v26 = vld [vmem:[%s4668_s16 + $0x430] sm:$0xf0] }
 0x192   : > { %2575 = vmatpush.bf16.msra.mxu1 %v3715_v39  ;;  %v3079_v39 = vor.u32 %v3966_v30, %v3078_v28  ;;  %v2260_v50 = vadd.f32 %v2259_v44, %v936_v32  ;;  %v4056_v44 = vld [vmem:[%s4668_s16 + $0x408] sm:$0xf0] }
 0x193   : > { %2567 = vmatpush.bf16.msrb.mxu2 %v3455_v1  ;;  %v3038_v1 = vld [vmem:[%s4668_s16 + $0xd8] sm:$0xf] }
 0x194   : > { %2593 = vmatpush.bf16.msrb.mxu3 %v3775_v43  ;;  %v4098_v43 = vld [vmem:[%s4668_s16 + $0x55c] sm:$0xf]  ;;  %v2273_v55 = vadd.f32 %v5140_v57, %v2260_v50  ;;  %v3039_v10 = vor.u32 %v3956_v2, %v3038_v1 }
 0x195   : > { %2628 = vmatpush.bf16.msra.mxu0 %v3219_v48  ;;  %v3058_v48 = vld [vmem:[%s4668_s16 + $0x100] sm:$0xf] }
 0x196   : > { %2576 = vmatpush.bf16.msra.mxu1 %v3695_v54  ;;  %v4071_v54 = vld [vmem:[%s4668_s16 + $0x480] sm:$0xf0]  ;;  %v2287_v56 = vpop.f32.mrf.mxu1  ;;  %v3059_v59 = vor.u32 %v3961_v49, %v3058_v48  ;;  %v2286_v3 = vadd.f32 %v2285_v21, %v2273_v55  ;;  %v4166_v21 = vld [vmem:[%s4668_s16 + $0x778] sm:$0xf0] }
 0x197   : > { %2568 = vmatpush.bf16.msrb.mxu2 %v3435_v17  ;;  %v3499_v57 = vor.u32 %v4071_v54, %v3498_v53  ;;  %v3951_v17 = vld [vmem:[%s4668_s16 + $0xc0] sm:$0xf0]  ;;  %v3879_v32 = vor.u32 %v4166_v21, %v3878_v19  ;;  %v3941_v53 = vld [vmem:[%s4668_s16 + $0x70] sm:$0xf0]  ;;  %v3838_v54 = vld [vmem:[%s4668_s16 + $0x718] sm:$0xf] }
 0x198   : > { %2594 = vmatpush.bf16.msrb.mxu3 %v3755_v58  ;;  %3923 = vmatmul.msk.bf16.vlgmr.msrb.gmra.mxu0 %vm2246_vm3, %v4883_v47  ;;  %v3615_v58 = vor.u32 %v4098_v43, %v3612_v46  ;;  %v5186_v63 = vpop.f32.mrf.mxu0  ;;  %v3019_v30 = vor.u32 %v3951_v17, %v3018_v16  ;;  %v3438_v43 = vld [vmem:[%s4668_s16 + $0x3f8] sm:$0xf]  ;;  %v3931_v21 = vld [vmem:[%s4668_s16 + $0x20] sm:$0xf0] }
 0x199   : > { %2629 = vmatpush.bf16.msra.mxu0 %v3199_v61  ;;  %v3976_v61 = vld [vmem:[%s4668_s16 + $0x188] sm:$0xf0]  ;;  %v2261_v14 = vpop.f32.mrf.mxu3  ;;  %v3439_v56 = vor.u32 %v4056_v44, %v3438_v43  ;;  %v4121_v43 = vld [vmem:[%s4668_s16 + $0x610] sm:$0xf0] }
 0x19a   : > { %2577 = vmatpush.bf16.msra.mxu1 %v3675_v5  ;;  %v3119_v4 = vor.u32 %v3976_v61, %v3118_v60  ;;  %v3478_v5 = vld [vmem:[%s4668_s16 + $0x448] sm:$0xf]  ;;  %v4036_v60 = vld [vmem:[%s4668_s16 + $0x368] sm:$0xf0]  ;;  %v3418_v61 = vld [vmem:[%s4668_s16 + $0x3d0] sm:$0xf] }
 0x19b   : > { %2569 = vmatpush.bf16.msrb.mxu2 %v3415_v34  ;;  %v3479_v20 = vor.u32 %v4066_v6, %v3478_v5  ;;  %v2998_v34 = vld [vmem:[%s4668_s16 + $0x88] sm:$0xf]  ;;  %v3818_v5 = vld [vmem:[%s4668_s16 + $0x6f0] sm:$0xf] }
 0x19c   : > { %2595 = vmatpush.bf16.msrb.mxu3 %v3735_v8  ;;  %v3595_v8 = vor.u32 %v4093_v62, %v3592_v0  ;;  %v2999_v46 = vor.u32 %v3946_v36, %v2998_v34  ;;  %v4051_v62 = vld [vmem:[%s4668_s16 + $0x3e0] sm:$0xf0]  ;;  %v3778_v34 = vld [vmem:[%s4668_s16 + $0x6a0] sm:$0xf] }
 0x19d   : > { %2630 = vmatpush.bf16.msra.mxu0 %v3179_v13  ;;  %v3572_v13 = vld [vmem:[%s4668_s16 + $0x51c] sm:$0xf0] }
 0x19e   : > { %2578 = vmatpush.bf16.msra.mxu1 %v3655_v9  ;;  %2570 = vmatmul.bf16.vlgmr.msrb.gmra.mxu2 %v4878_v40  ;;  %v3398_v9 = vld [vmem:[%s4668_s16 + $0x3a8] sm:$0xf]  ;;  %v2337_v27 = vpop.f32.mrf.mxu1 }
 0x19f   : > { %2596 = vmatmul.bf16.vlgmr.msrb.gmra.mxu3 %v4863_v15  ;;  %2614 = vmatpush.bf16.msra.mxu2 %v3079_v39  ;;  %v4161_v39 = vld [vmem:[%s4668_s16 + $0x750] sm:$0xf0] }
 0x1a0   : > { %2653 = vmatpush.bf16.msra.mxu3 %v3559_v12  ;;  %v4088_v12 = vld [vmem:[%s4668_s16 + $0x50c] sm:$0xf]  ;;  %v3859_v50 = vor.u32 %v4161_v39, %v3858_v37  ;;  %v3298_v39 = vld [vmem:[%s4668_s16 + $0x2e0] sm:$0xf] }
 0x1a1   : > { %2631 = vmatpush.bf16.msra.mxu0 %v3159_v33  ;;  %v3575_v28 = vor.u32 %v4088_v12, %v3572_v13  ;;  %v3399_v33 = vor.u32 %v4046_v22, %v3398_v9  ;;  %v2298_v48 = vpop.f32.mrf.mxu2  ;;  %v4031_v12 = vld [vmem:[%s4668_s16 + $0x340] sm:$0xf0]  ;;  %v3798_v9 = vld [vmem:[%s4668_s16 + $0x6c8] sm:$0xf]  ;;  %v4146_v22 = vld [vmem:[%s4668_s16 + $0x6d8] sm:$0xf0] }
 0x1a2   : > { %2579 = vmatpush.bf16.msra.mxu1 %v3635_v38  ;;  %v3459_v38 = vor.u32 %v4061_v26, %v3458_v25  ;;  %v2311_v49 = vpop.f32.mrf.mxu3  ;;  %v2299_v55 = vadd.f32 %v2298_v48, %v2286_v3  ;;  %v2958_v3 = vld [vmem:[%s4668_s16 + $0x38] sm:$0xf]  ;;  %v3339_v19 = vor.u32 %v4031_v12, %v3338_v11  ;;  %v4026_v25 = vld [vmem:[%s4668_s16 + $0x318] sm:$0xf0]  ;;  %v3718_v26 = vld [vmem:[%s4668_s16 + $0x628] sm:$0xf] }
 0x1a3   : > { %2615 = vmatpush.bf16.msra.mxu2 %v3059_v59  ;;  %v3358_v59 = vld [vmem:[%s4668_s16 + $0x358] sm:$0xf] }
 0x1a4   : > { %2654 = vmatpush.bf16.msra.mxu3 %v3539_v31  ;;  %v2326_v31 = vpop.f32.mrf.mxu0  ;;  %v2312_v0 = vadd.f32 %v2311_v49, %v2299_v55  ;;  %v3758_v49 = vld [vmem:[%s4668_s16 + $0x678] sm:$0xf] }
 0x1a5   : > { %2632 = vmatpush.bf16.msra.mxu0 %v3139_v52  ;;  %v2978_v52 = vld [vmem:[%s4668_s16 + $0x60] sm:$0xf]  ;;  %v3799_v31 = vor.u32 %v4146_v22, %v3798_v9  ;;  %v3678_v55 = vld [vmem:[%s4668_s16 + $0x5d8] sm:$0xf]  ;;  %v4101_v22 = vld [vmem:[%s4668_s16 + $0x570] sm:$0xf0] }
 0x1a6   : > { %2580 = vmatpush.bf16.msra.mxu1 %v3615_v58  ;;  %v4156_v58 = vld [vmem:[%s4668_s16 + $0x728] sm:$0xf0]  ;;  %v2339_v1 = vpop.f32.mrf.mxu1  ;;  %v2325_v6 = vadd.f32 %v5186_v63, %v2312_v0  ;;  %v4131_v0 = vld [vmem:[%s4668_s16 + $0x660] sm:$0xf0]  ;;  %v3618_v9 = vld [vmem:[%s4668_s16 + $0x560] sm:$0xf] }
 0x1a7   : > { %2616 = vmatpush.bf16.msra.mxu2 %v3039_v10  ;;  %v3839_v2 = vor.u32 %v4156_v58, %v3838_v54  ;;  %v4151_v10 = vld [vmem:[%s4668_s16 + $0x700] sm:$0xf0]  ;;  %v4016_v54 = vld [vmem:[%s4668_s16 + $0x2c8] sm:$0xf0] }
 0x1a8   : > { %2655 = vmatpush.bf16.msra.mxu3 %v3519_v51  ;;  %v3379_v51 = vor.u32 %v4041_v42, %v3378_v29  ;;  %v5233_v13 = vadd.f32 %v2337_v27, %v2325_v6  ;;  %v3819_v17 = vor.u32 %v4151_v10, %v3818_v5  ;;  %v4126_v27 = vld [vmem:[%s4668_s16 + $0x638] sm:$0xf0]  ;;  %v4021_v29 = vld [vmem:[%s4668_s16 + $0x2f0] sm:$0xf0]  ;;  %v3698_v42 = vld [vmem:[%s4668_s16 + $0x600] sm:$0xf] }
 0x1a9   : > { %2633 = vmatpush.bf16.msra.mxu0 %v3119_v4  ;;  %v3936_v4 = vld [vmem:[%s4668_s16 + $0x48] sm:$0xf0]  ;;  %v2300_v63 = vpop.f32.mrf.mxu2  ;;  %v3719_v37 = vor.u32 %v4126_v27, %v3718_v26  ;;  %v3299_v48 = vor.u32 %v4021_v29, %v3298_v39  ;;  %v3619_v26 = vor.u32 %v4101_v22, %v3618_v9 }
 0x1aa   : > { %2581 = vmatpush.bf16.msra.mxu1 %v3595_v8  ;;  %v3419_v8 = vor.u32 %v4051_v62, %v3418_v61  ;;  %v2959_v14 = vor.u32 %v3936_v4, %v2958_v3  ;;  %v2313_v16 = vpop.f32.mrf.mxu3  ;;  %v3738_v62 = vld [vmem:[%s4668_s16 + $0x650] sm:$0xf]  ;;  %v4111_v3 = vld [vmem:[%s4668_s16 + $0x5c0] sm:$0xf0]  ;;  %v3918_v4 = vld [vmem:[%s4668_s16 + $0x7b8] sm:$0xf] }
 0x1ab   : > { %2617 = vmatpush.bf16.msra.mxu2 %v3019_v30  ;;  %v4176_v5 = vld [vmem:[%s4668_s16 + $0x7c8] sm:$0xf0]  ;;  %v3739_v10 = vor.u32 %v4131_v0, %v3738_v62  ;;  %v3638_v63 = vld [vmem:[%s4668_s16 + $0x588] sm:$0xf] }
 0x1ac   : > { %2656 = vmatpush.bf16.msra.mxu3 %v3499_v57  ;;  %v3359_v57 = vor.u32 %v4036_v60, %v3358_v59  ;;  %v5228_v7 = vpop.f32.mrf.mxu0  ;;  %v3919_v16 = vor.u32 %v4176_v5, %v3918_v4 }
 0x1ad   : > { %2634 = vmatpush.bf16.msra.mxu0 %v3099_v24  ;;  %v3318_v24 = vld [vmem:[%s4668_s16 + $0x308] sm:$0xf] }
 0x1ae   : > { %2582 = vmatpush.bf16.msra.mxu1 %v3575_v28  ;;  %v2363_v28 = vpop.f32.mrf.mxu1 }
 0x1af   : > { %2618 = vmatpush.bf16.msra.mxu2 %v2999_v46 }
 0x1b0   : > { %2657 = vmatpush.bf16.msra.mxu3 %v3479_v20  ;;  %2635 = vmatmul.bf16.vlgmr.msra.gmra.mxu0 %v4826_v23  ;;  %v2979_v23 = vor.u32 %v3941_v53, %v2978_v52  ;;  %v2938_v20 = vld [vmem:[%s4668_s16 + $0x10] sm:$0xf]  ;;  %v4136_v52 = vld [vmem:[%s4668_s16 + $0x688] sm:$0xf0]  ;;  %v3278_v53 = vld [vmem:[%s4668_s16 + $0x2b8] sm:$0xf] }
 0x1b1   : > { %2679 = vmatpush.bf16.msrb.mxu0 %v3879_v32  ;;  %2583 = vmatmul.bf16.vlgmr.msra.gmra.mxu1 %v4874_v35  ;;  %v2939_v30 = vor.u32 %v3931_v21, %v2938_v20  ;;  %v3319_v32 = vor.u32 %v4026_v25, %v3318_v24  ;;  %v2350_v44 = vpop.f32.mrf.mxu2  ;;  %v3759_v60 = vor.u32 %v4136_v52, %v3758_v49  ;;  %v4171_v20 = vld [vmem:[%s4668_s16 + $0x7a0] sm:$0xf0] }
 0x1b2   : > { %2640 = vmatpush.bf16.msrb.mxu1 %v3399_v33  ;;  %v937_v33 = vperm.slane %v5158_v18, 1  ;;  %v3279_v61 = vor.u32 %v4016_v54, %v3278_v53 }
 0x1b3   : > { %2619 = vmatpush.bf16.msra.mxu2 %v2979_v23 }
 0x1b4   : > { %2658 = vmatpush.bf16.msra.mxu3 %v3459_v38  ;;  %v2391_v36 = vpop.f32.mrf.mxu0  ;;  %v4141_v38 = vld [vmem:[%s4668_s16 + $0x6b0] sm:$0xf0] }
 0x1b5   : > { %2680 = vmatpush.bf16.msrb.mxu0 %v3859_v50  ;;  %v3779_v46 = vor.u32 %v4141_v38, %v3778_v34  ;;  %v2376_v50 = vpop.f32.mrf.mxu3  ;;  %v4091_v34 = vld [vmem:[%s4668_s16 + $0x520] sm:$0xf0]  ;;  %v5281_v36 = vld [vmem:[%s393_s15] sm:$0x1f] }
 0x1b6   : > { %2641 = vmatpush.bf16.msrb.mxu1 %v3379_v51  ;;  %v3699_v51 = vor.u32 %v4121_v43, %v3698_v42  ;;  %v2365_v59 = vpop.f32.mrf.mxu1  ;;  %v2705_v42 = vmax.f32 %v5233_v13, 0.0  ;;  %v2712_v43 = vperm.slane %v5281_v36, 0  ;;  %v938_v13 = vperm.slane %v5158_v18, 2 }
 0x1b7   : > { %2620 = vmatpush.bf16.msra.mxu2 %v2959_v14 }
 0x1b8   : > { %2659 = vmatpush.bf16.msra.mxu3 %v3439_v56  ;;  %v4116_v56 = vld [vmem:[%s4668_s16 + $0x5e8] sm:$0xf0]  ;;  %v2722_v49 = vmul.f32 %v2712_v43, %v2705_v42 }
 0x1b9   : > { %2681 = vmatpush.bf16.msrb.mxu0 %v3839_v2  ;;  %v3679_v23 = vor.u32 %v4116_v56, %v3678_v55  ;;  %v3258_v2 = vld [vmem:[%s4668_s16 + $0x290] sm:$0xf] }
 0x1ba   : > { %2642 = vmatpush.bf16.msrb.mxu1 %v3359_v57  ;;  %v3658_v57 = vld [vmem:[%s4668_s16 + $0x5b0] sm:$0xf] }
 0x1bb   : > { %2621 = vmatpush.bf16.msra.mxu2 %v2939_v30  ;;  %v3659_v14 = vor.u32 %v4111_v3, %v3658_v57  ;;  %v3598_v30 = vld [vmem:[%s4668_s16 + $0x538] sm:$0xf] }
 0x1bc   : > { %2660 = vmatpush.bf16.msra.mxu3 %v3419_v8  ;;  %v2352_v8 = vpop.f32.mrf.mxu2 }
 0x1bd   : > { %2682 = vmatpush.bf16.msrb.mxu0 %v3819_v17  ;;  %v2378_v12 = vpop.f32.mrf.mxu3  ;;  %v4106_v17 = vld [vmem:[%s4668_s16 + $0x598] sm:$0xf0]  ;;  %v939_v8 = vperm.slane %v5158_v18, 3 }
 0x1be   : > { %2643 = vmatpush.bf16.msrb.mxu1 %v3339_v19  ;;  %2622 = vmatmul.bf16.vlgmr.msra.gmra.mxu2 %v4837_v41  ;;  %v4011_v41 = vld [vmem:[%s4668_s16 + $0x2a0] sm:$0xf0]  ;;  %v3898_v19 = vld [vmem:[%s4668_s16 + $0x790] sm:$0xf] }
 0x1bf   : > { %2661 = vmatmul.bf16.vlgmr.msra.gmra.mxu3 %v4878_v40  ;;  %2666 = vmatpush.bf16.msrb.mxu2 %v3719_v37  ;;  %v2351_v40 = vadd.f32 %v2350_v44, %v937_v33  ;;  %v3259_v11 = vor.u32 %v4011_v41, %v3258_v2  ;;  %v3899_v21 = vor.u32 %v4171_v20, %v3898_v19  ;;  %v3578_v33 = vld [vmem:[%s4668_s16 + $0x510] sm:$0xf] }
 0x1c0   : > { %v3579_v39 = vor.u32 %v4091_v34, %v3578_v33  ;;  %v2715_v34 = vperm.slane %v5281_v36, 3 }
 0x1c1   : > { %2683 = vmatpush.bf16.msrb.mxu0 %v3799_v31  ;;  %v2364_v58 = vadd.f32 %v2363_v28, %v2351_v40  ;;  %v4096_v31 = vld [vmem:[%s4668_s16 + $0x548] sm:$0xf0] }
 0x1c2   : > { %2644 = vmatpush.bf16.msrb.mxu1 %v3319_v32  ;;  %v3599_v32 = vor.u32 %v4096_v31, %v3598_v30 }
 0x1c3   : > { %v2377_v1 = vadd.f32 %v2376_v50, %v2364_v58  ;;  %2667 = vmatpush.bf16.msrb.mxu2 %v3699_v51 }
 0x1c4   : > { %v2402_v24 = vpop.f32.mrf.mxu2 }
 0x1c5   : > { %2684 = vmatpush.bf16.msrb.mxu0 %v3779_v46  ;;  %v2390_v6 = vadd.f32 %v5228_v7, %v2377_v1  ;;  %v3639_v7 = vor.u32 %v4106_v17, %v3638_v63  ;;  %v2428_v25 = vpop.f32.mrf.mxu3  ;;  %v2441_v28 = vpop.f32.mrf.mxu0  ;;  %v2713_v46 = vperm.slane %v5281_v36, 1 }
 0x1c6   : > { %2645 = vmatpush.bf16.msrb.mxu1 %v3299_v48  ;;  %v2442_v54 = vadd.f32 %v2441_v28, %v938_v13 }
 0x1c7   : > { %2668 = vmatpush.bf16.msrb.mxu2 %v3679_v23  ;;  %v2403_v27 = vadd.f32 %v2402_v24, %v2390_v6  ;;  %v2714_v6 = vperm.slane %v5281_v36, 2 }
 0x1c9   : > { %2685 = vmatpush.bf16.msrb.mxu0 %v3759_v60 }
 0x1ca   : > { %2646 = vmatpush.bf16.msrb.mxu1 %v3279_v61 }
 0x1cb   : > { %2669 = vmatpush.bf16.msrb.mxu2 %v3659_v14 }
 0x1cd   : > { %2686 = vmatpush.bf16.msrb.mxu0 %v3739_v10  ;;  %v2430_v38 = vpop.f32.mrf.mxu3  ;;  %v2443_v29 = vpop.f32.mrf.mxu0 }
 0x1ce   : > { %2647 = vmatpush.bf16.msrb.mxu1 %v3259_v11 }
 0x1cf   : > { %2670 = vmatpush.bf16.msrb.mxu2 %v3639_v7 }
 0x1d0   : > { %2687 = vmatmul.bf16.vlgmr.msrb.gmra.mxu0 %v4863_v15  ;;  %v2415_v15 = vpop.f32.mrf.mxu1 }
 0x1d1   : > { %2648 = vmatmul.bf16.vlgmr.msrb.gmra.mxu1 %v4841_v45  ;;  %v2416_v37 = vadd.f32 %v2415_v15, %v2403_v27  ;;  %v2404_v45 = vpop.f32.mrf.mxu2 }
 0x1d2   : > { %2698 = vmatpush.bf16.msra.mxu1 %v3919_v16 }
 0x1d3   : > { %2671 = vmatpush.bf16.msrb.mxu2 %v3619_v26  ;;  %v2429_v44 = vadd.f32 %v2428_v25, %v2416_v37 }
 0x1d5   : > { %v2706_v48 = vmax.f32 %v2429_v44, 0.0 }
 0x1d6   : > { %2699 = vmatpush.bf16.msra.mxu1 %v3899_v21 }
 0x1d7   : > { %2672 = vmatpush.bf16.msrb.mxu2 %v3599_v32  ;;  %v2723_v40 = vmul.f32 %v2713_v46, %v2706_v48 }
 0x1d8   : > { %v2417_v50 = vpop.f32.mrf.mxu1 }
 0x1d9   : > { %v2727_v51 = vadd.f32 %v2723_v40, %v2722_v49  ;;  %v940_v49 = vperm.slane %v5158_v18, 4 }
 0x1da   : > { %v2467_v52 = vpop.f32.mrf.mxu3 }
 0x1db   : > { %2673 = vmatpush.bf16.msrb.mxu2 %v3579_v39 }
 0x1de   : > { %2674 = vmatmul.bf16.vlgmr.msrb.gmra.mxu2 %v4874_v35 }
 0x1e1   : > { %3924 = vmatmul.msk.bf16.vlgmr.msra.gmra.mxu1 %vm2246_vm3, %v4883_v47  ;;  %v2454_v55 = vpop.f32.mrf.mxu2 }
 0x1e2   : > { %v2469_v53 = vpop.f32.mrf.mxu3  ;;  %v2455_v56 = vadd.f32 %v2454_v55, %v2442_v54 }
 0x1e4   : > { %v2468_v59 = vadd.f32 %v2467_v52, %v2455_v56 }
 0x1e5   : > { %v2493_v58 = vpop.f32.mrf.mxu0 }
 0x1e9   : > { %v2456_v62 = vpop.f32.mrf.mxu2 }
 0x1ea   : > { %v2519_v60 = vpop.f32.mrf.mxu3 }
 0x1ed   : > { %v2495_v35 = vpop.f32.mrf.mxu0 }
 0x1ee   : > { %v2480_v61 = vpop.f32.mrf.mxu1 }
 0x1ef   : > { %v2481_v47 = vadd.f32 %v2480_v61, %v2468_v59  ;;  %v2716_v61 = vperm.slane %v5281_v36, 4 }
 0x1f1   : > { %v2494_v0 = vadd.f32 %v2493_v58, %v2481_v47 }
 0x1f2   : > { %v2521_v1 = vpop.f32.mrf.mxu3 }
 0x1f3   : > { %v4257_v1 = vld [vmem:[%s454_s21] ss:$0 sm:$0xff] }
 0x1f6   : > { %v2482_v23 = vpop.f32.mrf.mxu1 }
 0x201   : > { %v2506_v41 = vpop.f32.mrf.mxu2 }
 0x202   : > { %v2545_v2 = vpop.f32.mrf.mxu3  ;;  %v2507_v57 = vadd.f32 %v2506_v41, %v2494_v0 }
 0x204   : > { %v2520_v5 = vadd.f32 %v2519_v60, %v2507_v57 }
 0x205   : > { %v2558_v3 = vpop.f32.mrf.mxu0 }
 0x206   : > { %v2707_v10 = vmax.f32 %v2520_v5, 0.0 }
 0x208   : > { %v2724_v11 = vmul.f32 %v2714_v6, %v2707_v10 }
 0x209   : > { %v2508_v63 = vpop.f32.mrf.mxu2 }
 0x20a   : > { %v2547_v4 = vpop.f32.mrf.mxu3  ;;  %v2728_v17 = vadd.f32 %v2727_v51, %v2724_v11 }
 0x20d   : > { %v2560_v16 = vpop.f32.mrf.mxu0 }
 0x20e   : > { %v2532_v12 = vpop.f32.mrf.mxu1 }
 0x20f   : > { %v2533_v14 = vadd.f32 %v2532_v12, %v939_v8 }
 0x211   : > { %v2546_v19 = vadd.f32 %v2545_v2, %v2533_v14 }
 0x213   : > { %v2559_v20 = vadd.f32 %v2558_v3, %v2546_v19 }
 0x215   : > { %v2610_v21 = vpop.f32.mrf.mxu0 }
 0x216   : > { %v2534_v7 = vpop.f32.mrf.mxu1 }
 0x21d   : > { %v2612_v22 = vpop.f32.mrf.mxu0 }
 0x221   : > { %v2571_v24 = vpop.f32.mrf.mxu2 }
 0x222   : > { %v2597_v9 = vpop.f32.mrf.mxu3  ;;  %v2572_v26 = vadd.f32 %v2571_v24, %v2559_v20 }
 0x229   : > { %v2573_v31 = vpop.f32.mrf.mxu2 }
 0x22a   : > { %v2599_v25 = vpop.f32.mrf.mxu3 }
 0x22d   : > { %v2636_v27 = vpop.f32.mrf.mxu0 }
 0x22e   : > { %v2584_v28 = vpop.f32.mrf.mxu1 }
 0x22f   : > { %v2585_v30 = vadd.f32 %v2584_v28, %v2572_v26 }
 0x231   : > { %v2598_v32 = vadd.f32 %v2597_v9, %v2585_v30 }
 0x233   : > { %v2611_v33 = vadd.f32 %v2610_v21, %v2598_v32 }
 0x235   : > { %v2708_v15 = vmax.f32 %v2611_v33, 0.0  ;;  %v2638_v37 = vpop.f32.mrf.mxu0 }
 0x236   : > { %v2586_v45 = vpop.f32.mrf.mxu1 }
 0x237   : > { %v2725_v38 = vmul.f32 %v2715_v34, %v2708_v15 }
 0x239   : > { %v2729_v39 = vadd.f32 %v2728_v17, %v2725_v38 }
 0x241   : > { %v2623_v42 = vpop.f32.mrf.mxu2 }
 0x242   : > { %v2662_v29 = vpop.f32.mrf.mxu3  ;;  %v2624_v51 = vadd.f32 %v2623_v42, %v940_v49 }
 0x244   : > { %v2637_v52 = vadd.f32 %v2636_v27, %v2624_v51 }
 0x249   : > { %v2625_v48 = vpop.f32.mrf.mxu2 }
 0x24a   : > { %v2664_v43 = vpop.f32.mrf.mxu3 }
 0x24d   : > { %v2688_v44 = vpop.f32.mrf.mxu0 }
 0x24e   : > { %v2649_v46 = vpop.f32.mrf.mxu1 }
 0x24f   : > { %v2650_v53 = vadd.f32 %v2649_v46, %v2637_v52 }
 0x251   : > { %v2663_v54 = vadd.f32 %v2662_v29, %v2650_v53 }
 0x255   : > { %v2690_v40 = vpop.f32.mrf.mxu0 }
 0x256   : > { %v2651_v50 = vpop.f32.mrf.mxu1 }
 0x25e   : > { %v2701_v13 = vpop.f32.mrf.mxu1 }
 0x261   : > { %v2675_v55 = vpop.f32.mrf.mxu2 }
 0x262   : > { %v2676_v56 = vadd.f32 %v2675_v55, %v2663_v54 }
 0x264   : > { %v2689_v59 = vadd.f32 %v2688_v44, %v2676_v56 }
 0x266   : > { %v2703_v58 = vpop.f32.mrf.mxu1  ;;  %v2702_v60 = vadd.f32 %v2701_v13, %v2689_v59 }
 0x268   : > { %v2709_v47 = vmax.f32 %v2702_v60, 0.0 }
 0x269   : > { %v2677_v62 = vpop.f32.mrf.mxu2 }
 0x26a   : > { %v2726_v18 = vmul.f32 %v2716_v61, %v2709_v47 }
 0x26c   : > { %v2731_v35 = vsel %vm2730_vm4, %v2726_v18, 0.0 }
 0x26d   : > { %v2732_v0 = vadd.f32 %v2731_v35, %v2729_v39 }
 0x26f   : > { %2733 = vadd.xlane.f32.xlu0 %v2732_v0 }
 0x2e2   : > { %v2734_v23 = vpop.xlane.xlu0 %2733 }
 0x2e3   : > { %v2739_v2 = vadd.f32 %v4257_v1, %v2734_v23 }
 0x2e5   : > { %v2740_v36 = vmax.f32 %v2739_v2, 0.0 }
 0x2e7   : > { %2742 = vst.msk [vmem:[%s458_s14] sm:$0xff] %vm2741_vm5, %v2740_v36 }
 0x2e8 PF: > { %s5343_s20 = sld [smem:[#allocation13_spill]]  ;;  %p21_p7 = scmp.ge.s32.totalorder %s4517_s28, 4  }
 0x2e9   : > { %s5344_s24 = smov %s4442_s25  ;;  %s5345_s25 = smov %s4446_s26 }
 0x2ea   : > { %s5347_s27 = smov %s4517_s28  ;;  %23 = sbr.rel (!%p21_p7) target bundleno = 10 (0xa), region = 134 }
 0x2ee   : > { %s5346_s26 = smov %s5343_s20 }
 0x2ef   :  { %2762 = vsyncpa [#allocation3], 1 }
 0x2f0   :  { %2764 = vsyncpa [#allocation3 + $0x1], 1 }
 0x2f1   :  { %2765 = vsyncpa [#allocation5], 1 }
 0x2f2   :  { %2767 = vsyncpa [#allocation5 + $0x1], 1 }
 0x2f3   :  { %2768 = vsyncpa [#allocation8], 1 }
 0x2f4   :  { %2770 = vsyncpa [#allocation8 + $0x1], 1 }

</bundles_post_ra>
